<compile_context>
chip_gen: v7x
topology: tpu7x:2x2x1
jax: 0.10.0
libtpu: 0.0.40
codegen_flags: <defaults>
</compile_context>

<pallas_src>
import functools

import jax
import jax.numpy as jnp
from jax.experimental import pallas as pl
from jax.experimental.pallas import tpu as pltpu

_LANES = 128
_BN_EPS = 1e-5


def _round_up(x, m):
    return (x + m - 1) // m * m


# ----------------------------- Pallas kernel --------------------------------

def _fused_matmul_kernel(x_ref, w_ref, scale_ref, shift_ref, o_ref, *, act):
    # x_ref: (tm, K) bf16 patch rows, w_ref: (K, Cp) bf16, scale/shift: (1, Cp) f32
    y = jnp.dot(x_ref[...], w_ref[...], preferred_element_type=jnp.float32)
    y = y * scale_ref[...] + shift_ref[...]
    if act == "lrelu":
        y = jnp.where(y > 0, y, 0.2 * y)                      # LeakyReLU(0.2)
    elif act == "sigmoid":
        # exp on EUP + approx reciprocal on EUP -> no VPU divide
        y = pl.reciprocal(1.0 + jnp.exp(-y), approx=True)
    o_ref[...] = y.astype(o_ref.dtype)


def fused_matmul(patches, w2d, scale, shift, act, out_dtype=jnp.float32):
    """out[:, :C] = act((patches @ w2d) * scale + shift); padded to 128 lanes internally."""
    M, K = patches.shape
    Kw, C = w2d.shape
    assert Kw == K
    Cp = _round_up(C, _LANES)

    # Lane-dense output: pad weight columns / scale / shift to a multiple of 128 lanes so
    # the kernel's stores are full, unmasked vst; slice the pad off in the wrapper.
    w_p = jnp.pad(w2d, ((0, 0), (0, Cp - C)))
    s_p = jnp.pad(scale.reshape(1, C).astype(jnp.float32), ((0, 0), (0, Cp - C)))
    b_p = jnp.pad(shift.reshape(1, C).astype(jnp.float32), ((0, 0), (0, Cp - C)))

    # Row tile: activations here are tiny, so take the whole M as one block; split into
    # two parallel blocks when cleanly possible so v7x's 2 TensorCores both get work.
    if M >= 16 and M % 16 == 0:
        tm = M // 2
    else:
        tm = M
    grid = (M // tm,)

    cost = pl.CostEstimate(
        flops=2 * M * K * Cp,
        transcendentals=(M * Cp if act == "sigmoid" else 0),
        bytes_accessed=(patches.size * patches.dtype.itemsize
                        + w_p.size * w_p.dtype.itemsize
                        + M * Cp * jnp.dtype(out_dtype).itemsize),
    )

    out = pl.pallas_call(
        functools.partial(_fused_matmul_kernel, act=act),
        out_shape=jax.ShapeDtypeStruct((M, Cp), out_dtype),
        grid_spec=pltpu.PrefetchScalarGridSpec(
            num_scalar_prefetch=0,
            grid=grid,
            in_specs=[
                pl.BlockSpec((tm, K), lambda i: (i, 0)),    # patch rows tile
                pl.BlockSpec((K, Cp), lambda i: (0, 0)),    # full weight, grid-invariant
                pl.BlockSpec((1, Cp), lambda i: (0, 0)),    # BN scale, grid-invariant
                pl.BlockSpec((1, Cp), lambda i: (0, 0)),    # BN shift / bias
            ],
            out_specs=pl.BlockSpec((tm, Cp), lambda i: (i, 0)),
        ),
        compiler_params=pltpu.CompilerParams(dimension_semantics=("parallel",)),
        cost_estimate=cost,
    )(patches, w_p, s_p, b_p)
    return out[:, :C]


# ------------------------------- JAX glue ------------------------------------

def im2col(x_nhwc, kh, kw, stride, pad):
    x = jnp.pad(x_nhwc, ((0, 0), (pad, pad), (pad, pad), (0, 0)))
    N, H, W, C = x.shape
    Ho = (H - kh) // stride + 1
    Wo = (W - kw) // stride + 1
    cols = []
    for i in range(kh):
        for j in range(kw):
            cols.append(x[:, i:i + stride * Ho:stride, j:j + stride * Wo:stride, :])
    # per-patch layout is (kh, kw, C_in), matching the weight transpose below
    p = jnp.concatenate(cols, axis=-1)
    return p.reshape(N * Ho * Wo, kh * kw * C), (N, Ho, Wo)


def _w2d(w_oihw):
    # PyTorch weight (C_out, C_in, kh, kw) -> (kh, kw, C_in, C_out) -> (K, C_out), bf16
    C_out, C_in, kh, kw = w_oihw.shape
    return jnp.transpose(w_oihw, (2, 3, 1, 0)).reshape(kh * kw * C_in, C_out).astype(jnp.bfloat16)


def conv_bn_act(x_nhwc, w_oihw, scale, shift, stride, pad, act, out_dtype=jnp.bfloat16):
    C_out, C_in, kh, kw = w_oihw.shape
    patches, (N, Ho, Wo) = im2col(x_nhwc.astype(jnp.bfloat16), kh, kw, stride, pad)
    out = fused_matmul(patches, _w2d(w_oihw), scale, shift, act, out_dtype=out_dtype)
    return out.reshape(N, Ho, Wo, C_out)


# ---------------------------- D_NET32 forward --------------------------------

def init_params(key, ndf, efg):
    ks = jax.random.split(key, 9)
    w = lambda k, shape: (0.05 * jax.random.normal(k, shape)).astype(jnp.float32)
    ones = lambda c: jnp.ones((c,), jnp.float32)
    zeros = lambda c: jnp.zeros((c,), jnp.float32)
    p = {}
    # encode_image_by_8times(ndf)
    p["w1"] = w(ks[0], (ndf, 3, 4, 4))
    p["w2"] = w(ks[1], (2 * ndf, ndf, 4, 4));      p["g2"] = ones(2 * ndf); p["b2"] = zeros(2 * ndf)
    p["w3"] = w(ks[2], (4 * ndf, 2 * ndf, 4, 4));  p["g3"] = ones(4 * ndf); p["b3"] = zeros(4 * ndf)
    p["w4"] = w(ks[3], (8 * ndf, 4 * ndf, 3, 3));  p["g4"] = ones(8 * ndf); p["b4"] = zeros(8 * ndf)
    # jointConv = Block3x3_leakRelu(8ndf + efg, 8ndf)
    p["wj"] = w(ks[4], (8 * ndf, 8 * ndf + efg, 3, 3)); p["gj"] = ones(8 * ndf); p["bj"] = zeros(8 * ndf)
    # logits / uncond_logits: Conv2d(8ndf, 1, 4, stride=4) (bias=True) + Sigmoid
    p["wl"] = w(ks[5], (1, 8 * ndf, 4, 4)); p["bl"] = w(ks[6], (1,))
    p["wu"] = w(ks[7], (1, 8 * ndf, 4, 4)); p["bu"] = w(ks[8], (1,))
    return p


def d_net32_forward(params, x_nchw, c_code, ndf, efg):
    x = jnp.transpose(x_nchw, (0, 2, 3, 1))  # NCHW -> NHWC
    ones = lambda c: jnp.ones((c,), jnp.float32)
    zeros = lambda c: jnp.zeros((c,), jnp.float32)
    # eval-mode BN with running_mean=0, running_var=1:  scale=g/sqrt(1+eps), shift=beta
    bn_scale = lambda g: g / jnp.sqrt(1.0 + _BN_EPS)

    # img_code_s8
    h = conv_bn_act(x, params["w1"], ones(ndf), zeros(ndf), 2, 1, "lrelu")                      # 32 -> 16
    h = conv_bn_act(h, params["w2"], bn_scale(params["g2"]), params["b2"], 2, 1, "lrelu")       # 16 -> 8
    h = conv_bn_act(h, params["w3"], bn_scale(params["g3"]), params["b3"], 2, 1, "lrelu")       # 8 -> 4
    x_code = conv_bn_act(h, params["w4"], bn_scale(params["g4"]), params["b4"], 1, 1, "lrelu")  # 4 -> 4

    # c_code.view(-1, efg, 1, 1).repeat(1, 1, 4, 4); cat((c_code, x_code), dim=channel)
    N = x_code.shape[0]
    c4 = jnp.broadcast_to(c_code.reshape(N, 1, 1, efg).astype(x_code.dtype), (N, 4, 4, efg))
    h_c = jnp.concatenate([c4, x_code], axis=-1)
    h_c = conv_bn_act(h_c, params["wj"], bn_scale(params["gj"]), params["bj"], 1, 1, "lrelu")

    # Fused logit heads: each is Conv2d(8ndf, 1, 4, stride=4) on a 4x4 map, i.e. a single
    # (N, 4*4*8ndf) dot.  Stack both inputs along rows and both weights along columns so
    # one Pallas call computes both sigmoid heads.
    p_cond, _ = im2col(h_c, 4, 4, 4, 0)              # (N, 16*8ndf)
    p_unc, _ = im2col(x_code, 4, 4, 4, 0)            # (N, 16*8ndf)
    rows = jnp.concatenate([p_cond, p_unc], axis=0)  # (2N, K), bf16
    w_heads = jnp.concatenate(
        [_w2d(params["wl"]), _w2d(params["wu"])], axis=1)          # (K, 2)
    scale = jnp.ones((2,), jnp.float32)
    shift = jnp.concatenate([params["bl"], params["bu"]]).astype(jnp.float32)
    out = fused_matmul(rows, w_heads, scale, shift, "sigmoid", out_dtype=jnp.float32)  # (2N, 2)
    out_cond = out[:N, 0]     # cond head uses column 0 on the first N rows
    out_uncond = out[N:, 1]   # uncond head uses column 1 on the last N rows
    return out_cond, out_uncond


if __name__ == "__main__":
    ndf, efg = 4, 8          # cfg.GAN.DF_DIM, cfg.GAN.EMBEDDING_DIM (small synthetic values)
    N = 2
    key = jax.random.PRNGKey(0)
    kp, kx, kc = jax.random.split(key, 3)
    params = init_params(kp, ndf, efg)
    x_var = jax.random.normal(kx, (N, 3, 32, 32), jnp.float32)   # NCHW, 32x32 images
    c_code = jax.random.normal(kc, (N, efg), jnp.float32)

    fwd = jax.jit(d_net32_forward, static_argnums=(3, 4))
    out_cond, out_uncond = fwd(params, x_var, c_code, ndf, efg)
    jax.block_until_ready((out_cond, out_uncond))
    assert out_cond.shape == (N,) and out_uncond.shape == (N,)
    assert bool(jnp.all((out_cond > 0) & (out_cond < 1)))
    assert bool(jnp.all((out_uncond > 0) & (out_uncond < 1)))
    print("KERNEL_OK")
</pallas_src>

<mosaic_0001>
module attributes {stable_mosaic.version = 11 : i64} {
  func.func @_fused_matmul_kernel(%arg0: i32, %arg1: memref<256x48xbf16, #tpu.memory_space<vmem>>, %arg2: memref<48x128xbf16, #tpu.memory_space<vmem>>, %arg3: memref<1x128xf32, #tpu.memory_space<vmem>>, %arg4: memref<1x128xf32, #tpu.memory_space<vmem>>, %arg5: memref<256x128xbf16, #tpu.memory_space<vmem>>) attributes {dimension_semantics = [#tpu.dimension_semantics<parallel>], iteration_bounds = array<i64: 2>, scalar_prefetch = 0 : i64, scratch_operands = 0 : i64, tpu.core_type = #tpu.core_type<tc>, window_params = [{transform_indices = @transform_0, window_bounds = array<i64: 256, 48>}, {pipeline_mode = #tpu.pipeline_mode<synchronous>, transform_indices = @transform_1, window_bounds = array<i64: 48, 128>}, {pipeline_mode = #tpu.pipeline_mode<synchronous>, transform_indices = @transform_2, window_bounds = array<i64: 1, 128>}, {pipeline_mode = #tpu.pipeline_mode<synchronous>, transform_indices = @transform_3, window_bounds = array<i64: 1, 128>}, {transform_indices = @transform_4, window_bounds = array<i64: 256, 128>}]} {
    %c0 = arith.constant 0 : index
    %c0_0 = arith.constant 0 : index
    %0 = vector.load %arg1[%c0, %c0_0] : memref<256x48xbf16, #tpu.memory_space<vmem>>, vector<256x48xbf16>
    %c0_1 = arith.constant 0 : index
    %c0_2 = arith.constant 0 : index
    %1 = vector.load %arg2[%c0_1, %c0_2] : memref<48x128xbf16, #tpu.memory_space<vmem>>, vector<48x128xbf16>
    %cst = arith.constant dense<0.000000e+00> : vector<256x128xf32>
    %2 = tpu.matmul %0, %1, %cst {dimension_numbers = #tpu.dot_dimension_numbers<[1], [0], [0], [1], [0, 0, 1, 1], [], []>} : vector<256x48xbf16>, vector<48x128xbf16>, vector<256x128xf32> -> vector<256x128xf32>
    %c0_3 = arith.constant 0 : index
    %c0_4 = arith.constant 0 : index
    %3 = vector.load %arg3[%c0_3, %c0_4] : memref<1x128xf32, #tpu.memory_space<vmem>>, vector<1x128xf32>
    %4 = vector.broadcast %3 : vector<1x128xf32> to vector<256x128xf32>
    %5 = arith.mulf %2, %4 : vector<256x128xf32>
    %c0_5 = arith.constant 0 : index
    %c0_6 = arith.constant 0 : index
    %6 = vector.load %arg4[%c0_5, %c0_6] : memref<1x128xf32, #tpu.memory_space<vmem>>, vector<1x128xf32>
    %7 = vector.broadcast %6 : vector<1x128xf32> to vector<256x128xf32>
    %8 = arith.addf %5, %7 : vector<256x128xf32>
    %cst_7 = arith.constant 0.000000e+00 : f32
    %9 = vector.broadcast %cst_7 : f32 to vector<256x128xf32>
    %10 = arith.cmpf ogt, %8, %9 : vector<256x128xf32>
    %cst_8 = arith.constant 2.000000e-01 : f32
    %11 = vector.broadcast %cst_8 : f32 to vector<256x128xf32>
    %12 = arith.mulf %11, %8 : vector<256x128xf32>
    %13 = arith.select %10, %8, %12 : vector<256x128xi1>, vector<256x128xf32>
    %14 = arith.truncf %13 : vector<256x128xf32> to vector<256x128xbf16>
    %c0_9 = arith.constant 0 : index
    %c0_10 = arith.constant 0 : index
    %15 = vector.load %arg5[%c0_9, %c0_10] : memref<256x128xbf16, #tpu.memory_space<vmem>>, vector<256x128xbf16>
    tpu.vector_store %arg5[%c0_9, %c0_10], %14 {strides = array<i32>} : memref<256x128xbf16, #tpu.memory_space<vmem>>, vector<256x128xbf16>,
    return
  }
  func.func @transform_0(%arg0: i32) -> (i32, i32) {
    %c0_i32 = arith.constant 0 : i32
    %c0_i32_0 = arith.constant 0 : i32
    return %arg0, %c0_i32 : i32, i32
  }
  func.func @transform_1(%arg0: i32) -> (i32, i32) {
    %c0_i32 = arith.constant 0 : i32
    %c0_i32_0 = arith.constant 0 : i32
    %c0_i32_1 = arith.constant 0 : i32
    return %c0_i32, %c0_i32_0 : i32, i32
  }
  func.func @transform_2(%arg0: i32) -> (i32, i32) {
    %c0_i32 = arith.constant 0 : i32
    %c0_i32_0 = arith.constant 0 : i32
    %c0_i32_1 = arith.constant 0 : i32
    return %c0_i32, %c0_i32_0 : i32, i32
  }
  func.func @transform_3(%arg0: i32) -> (i32, i32) {
    %c0_i32 = arith.constant 0 : i32
    %c0_i32_0 = arith.constant 0 : i32
    %c0_i32_1 = arith.constant 0 : i32
    return %c0_i32, %c0_i32_0 : i32, i32
  }
  func.func @transform_4(%arg0: i32) -> (i32, i32) {
    %c0_i32 = arith.constant 0 : i32
    %c0_i32_0 = arith.constant 0 : i32
    return %arg0, %c0_i32 : i32, i32
  }
}

module attributes {stable_mosaic.version = 11 : i64} {
  func.func @_fused_matmul_kernel(%arg0: i32, %arg1: memref<64x64xbf16, #tpu.memory_space<vmem>>, %arg2: memref<64x128xbf16, #tpu.memory_space<vmem>>, %arg3: memref<1x128xf32, #tpu.memory_space<vmem>>, %arg4: memref<1x128xf32, #tpu.memory_space<vmem>>, %arg5: memref<64x128xbf16, #tpu.memory_space<vmem>>) attributes {dimension_semantics = [#tpu.dimension_semantics<parallel>], iteration_bounds = array<i64: 2>, scalar_prefetch = 0 : i64, scratch_operands = 0 : i64, tpu.core_type = #tpu.core_type<tc>, window_params = [{transform_indices = @transform_0, window_bounds = array<i64: 64, 64>}, {pipeline_mode = #tpu.pipeline_mode<synchronous>, transform_indices = @transform_1, window_bounds = array<i64: 64, 128>}, {pipeline_mode = #tpu.pipeline_mode<synchronous>, transform_indices = @transform_2, window_bounds = array<i64: 1, 128>}, {pipeline_mode = #tpu.pipeline_mode<synchronous>, transform_indices = @transform_3, window_bounds = array<i64: 1, 128>}, {transform_indices = @transform_4, window_bounds = array<i64: 64, 128>}]} {
    %c0 = arith.constant 0 : index
    %c0_0 = arith.constant 0 : index
    %0 = vector.load %arg1[%c0, %c0_0] : memref<64x64xbf16, #tpu.memory_space<vmem>>, vector<64x64xbf16>
    %c0_1 = arith.constant 0 : index
    %c0_2 = arith.constant 0 : index
    %1 = vector.load %arg2[%c0_1, %c0_2] : memref<64x128xbf16, #tpu.memory_space<vmem>>, vector<64x128xbf16>
    %cst = arith.constant dense<0.000000e+00> : vector<64x128xf32>
    %2 = tpu.matmul %0, %1, %cst {dimension_numbers = #tpu.dot_dimension_numbers<[1], [0], [0], [1], [0, 0, 1, 1], [], []>} : vector<64x64xbf16>, vector<64x128xbf16>, vector<64x128xf32> -> vector<64x128xf32>
    %c0_3 = arith.constant 0 : index
    %c0_4 = arith.constant 0 : index
    %3 = vector.load %arg3[%c0_3, %c0_4] : memref<1x128xf32, #tpu.memory_space<vmem>>, vector<1x128xf32>
    %4 = vector.broadcast %3 : vector<1x128xf32> to vector<64x128xf32>
    %5 = arith.mulf %2, %4 : vector<64x128xf32>
    %c0_5 = arith.constant 0 : index
    %c0_6 = arith.constant 0 : index
    %6 = vector.load %arg4[%c0_5, %c0_6] : memref<1x128xf32, #tpu.memory_space<vmem>>, vector<1x128xf32>
    %7 = vector.broadcast %6 : vector<1x128xf32> to vector<64x128xf32>
    %8 = arith.addf %5, %7 : vector<64x128xf32>
    %cst_7 = arith.constant 0.000000e+00 : f32
    %9 = vector.broadcast %cst_7 : f32 to vector<64x128xf32>
    %10 = arith.cmpf ogt, %8, %9 : vector<64x128xf32>
    %cst_8 = arith.constant 2.000000e-01 : f32
    %11 = vector.broadcast %cst_8 : f32 to vector<64x128xf32>
    %12 = arith.mulf %11, %8 : vector<64x128xf32>
    %13 = arith.select %10, %8, %12 : vector<64x128xi1>, vector<64x128xf32>
    %14 = arith.truncf %13 : vector<64x128xf32> to vector<64x128xbf16>
    %c0_9 = arith.constant 0 : index
    %c0_10 = arith.constant 0 : index
    %15 = vector.load %arg5[%c0_9, %c0_10] : memref<64x128xbf16, #tpu.memory_space<vmem>>, vector<64x128xbf16>
    tpu.vector_store %arg5[%c0_9, %c0_10], %14 {strides = array<i32>} : memref<64x128xbf16, #tpu.memory_space<vmem>>, vector<64x128xbf16>,
    return
  }
  func.func @transform_0(%arg0: i32) -> (i32, i32) {
    %c0_i32 = arith.constant 0 : i32
    %c0_i32_0 = arith.constant 0 : i32
    return %arg0, %c0_i32 : i32, i32
  }
  func.func @transform_1(%arg0: i32) -> (i32, i32) {
    %c0_i32 = arith.constant 0 : i32
    %c0_i32_0 = arith.constant 0 : i32
    %c0_i32_1 = arith.constant 0 : i32
    return %c0_i32, %c0_i32_0 : i32, i32
  }
  func.func @transform_2(%arg0: i32) -> (i32, i32) {
    %c0_i32 = arith.constant 0 : i32
    %c0_i32_0 = arith.constant 0 : i32
    %c0_i32_1 = arith.constant 0 : i32
    return %c0_i32, %c0_i32_0 : i32, i32
  }
  func.func @transform_3(%arg0: i32) -> (i32, i32) {
    %c0_i32 = arith.constant 0 : i32
    %c0_i32_0 = arith.constant 0 : i32
    %c0_i32_1 = arith.constant 0 : i32
    return %c0_i32, %c0_i32_0 : i32, i32
  }
  func.func @transform_4(%arg0: i32) -> (i32, i32) {
    %c0_i32 = arith.constant 0 : i32
    %c0_i32_0 = arith.constant 0 : i32
    return %arg0, %c0_i32 : i32, i32
  }
}

module attributes {stable_mosaic.version = 11 : i64} {
  func.func @_fused_matmul_kernel(%arg0: i32, %arg1: memref<16x128xbf16, #tpu.memory_space<vmem>>, %arg2: memref<128x128xbf16, #tpu.memory_space<vmem>>, %arg3: memref<1x128xf32, #tpu.memory_space<vmem>>, %arg4: memref<1x128xf32, #tpu.memory_space<vmem>>, %arg5: memref<16x128xbf16, #tpu.memory_space<vmem>>) attributes {dimension_semantics = [#tpu.dimension_semantics<parallel>], iteration_bounds = array<i64: 2>, scalar_prefetch = 0 : i64, scratch_operands = 0 : i64, tpu.core_type = #tpu.core_type<tc>, window_params = [{transform_indices = @transform_0, window_bounds = array<i64: 16, 128>}, {pipeline_mode = #tpu.pipeline_mode<synchronous>, transform_indices = @transform_1, window_bounds = array<i64: 128, 128>}, {pipeline_mode = #tpu.pipeline_mode<synchronous>, transform_indices = @transform_2, window_bounds = array<i64: 1, 128>}, {pipeline_mode = #tpu.pipeline_mode<synchronous>, transform_indices = @transform_3, window_bounds = array<i64: 1, 128>}, {transform_indices = @transform_4, window_bounds = array<i64: 16, 128>}]} {
    %c0 = arith.constant 0 : index
    %c0_0 = arith.constant 0 : index
    %0 = vector.load %arg1[%c0, %c0_0] : memref<16x128xbf16, #tpu.memory_space<vmem>>, vector<16x128xbf16>
    %c0_1 = arith.constant 0 : index
    %c0_2 = arith.constant 0 : index
    %1 = vector.load %arg2[%c0_1, %c0_2] : memref<128x128xbf16, #tpu.memory_space<vmem>>, vector<128x128xbf16>
    %cst = arith.constant dense<0.000000e+00> : vector<16x128xf32>
    %2 = tpu.matmul %0, %1, %cst {dimension_numbers = #tpu.dot_dimension_numbers<[1], [0], [0], [1], [0, 0, 1, 1], [], []>} : vector<16x128xbf16>, vector<128x128xbf16>, vector<16x128xf32> -> vector<16x128xf32>
    %c0_3 = arith.constant 0 : index
    %c0_4 = arith.constant 0 : index
    %3 = vector.load %arg3[%c0_3, %c0_4] : memref<1x128xf32, #tpu.memory_space<vmem>>, vector<1x128xf32>
    %4 = vector.broadcast %3 : vector<1x128xf32> to vector<16x128xf32>
    %5 = arith.mulf %2, %4 : vector<16x128xf32>
    %c0_5 = arith.constant 0 : index
    %c0_6 = arith.constant 0 : index
    %6 = vector.load %arg4[%c0_5, %c0_6] : memref<1x128xf32, #tpu.memory_space<vmem>>, vector<1x128xf32>
    %7 = vector.broadcast %6 : vector<1x128xf32> to vector<16x128xf32>
    %8 = arith.addf %5, %7 : vector<16x128xf32>
    %cst_7 = arith.constant 0.000000e+00 : f32
    %9 = vector.broadcast %cst_7 : f32 to vector<16x128xf32>
    %10 = arith.cmpf ogt, %8, %9 : vector<16x128xf32>
    %cst_8 = arith.constant 2.000000e-01 : f32
    %11 = vector.broadcast %cst_8 : f32 to vector<16x128xf32>
    %12 = arith.mulf %11, %8 : vector<16x128xf32>
    %13 = arith.select %10, %8, %12 : vector<16x128xi1>, vector<16x128xf32>
    %14 = arith.truncf %13 : vector<16x128xf32> to vector<16x128xbf16>
    %c0_9 = arith.constant 0 : index
    %c0_10 = arith.constant 0 : index
    %15 = vector.load %arg5[%c0_9, %c0_10] : memref<16x128xbf16, #tpu.memory_space<vmem>>, vector<16x128xbf16>
    tpu.vector_store %arg5[%c0_9, %c0_10], %14 {strides = array<i32>} : memref<16x128xbf16, #tpu.memory_space<vmem>>, vector<16x128xbf16>,
    return
  }
  func.func @transform_0(%arg0: i32) -> (i32, i32) {
    %c0_i32 = arith.constant 0 : i32
    %c0_i32_0 = arith.constant 0 : i32
    return %arg0, %c0_i32 : i32, i32
  }
  func.func @transform_1(%arg0: i32) -> (i32, i32) {
    %c0_i32 = arith.constant 0 : i32
    %c0_i32_0 = arith.constant 0 : i32
    %c0_i32_1 = arith.constant 0 : i32
    return %c0_i32, %c0_i32_0 : i32, i32
  }
  func.func @transform_2(%arg0: i32) -> (i32, i32) {
    %c0_i32 = arith.constant 0 : i32
    %c0_i32_0 = arith.constant 0 : i32
    %c0_i32_1 = arith.constant 0 : i32
    return %c0_i32, %c0_i32_0 : i32, i32
  }
  func.func @transform_3(%arg0: i32) -> (i32, i32) {
    %c0_i32 = arith.constant 0 : i32
    %c0_i32_0 = arith.constant 0 : i32
    %c0_i32_1 = arith.constant 0 : i32
    return %c0_i32, %c0_i32_0 : i32, i32
  }
  func.func @transform_4(%arg0: i32) -> (i32, i32) {
    %c0_i32 = arith.constant 0 : i32
    %c0_i32_0 = arith.constant 0 : i32
    return %arg0, %c0_i32 : i32, i32
  }
}

module attributes {stable_mosaic.version = 11 : i64} {
  func.func @_fused_matmul_kernel(%arg0: i32, %arg1: memref<16x144xbf16, #tpu.memory_space<vmem>>, %arg2: memref<144x128xbf16, #tpu.memory_space<vmem>>, %arg3: memref<1x128xf32, #tpu.memory_space<vmem>>, %arg4: memref<1x128xf32, #tpu.memory_space<vmem>>, %arg5: memref<16x128xbf16, #tpu.memory_space<vmem>>) attributes {dimension_semantics = [#tpu.dimension_semantics<parallel>], iteration_bounds = array<i64: 2>, scalar_prefetch = 0 : i64, scratch_operands = 0 : i64, tpu.core_type = #tpu.core_type<tc>, window_params = [{transform_indices = @transform_0, window_bounds = array<i64: 16, 144>}, {pipeline_mode = #tpu.pipeline_mode<synchronous>, transform_indices = @transform_1, window_bounds = array<i64: 144, 128>}, {pipeline_mode = #tpu.pipeline_mode<synchronous>, transform_indices = @transform_2, window_bounds = array<i64: 1, 128>}, {pipeline_mode = #tpu.pipeline_mode<synchronous>, transform_indices = @transform_3, window_bounds = array<i64: 1, 128>}, {transform_indices = @transform_4, window_bounds = array<i64: 16, 128>}]} {
    %c0 = arith.constant 0 : index
    %c0_0 = arith.constant 0 : index
    %0 = vector.load %arg1[%c0, %c0_0] : memref<16x144xbf16, #tpu.memory_space<vmem>>, vector<16x144xbf16>
    %c0_1 = arith.constant 0 : index
    %c0_2 = arith.constant 0 : index
    %1 = vector.load %arg2[%c0_1, %c0_2] : memref<144x128xbf16, #tpu.memory_space<vmem>>, vector<144x128xbf16>
    %cst = arith.constant dense<0.000000e+00> : vector<16x128xf32>
    %2 = tpu.matmul %0, %1, %cst {dimension_numbers = #tpu.dot_dimension_numbers<[1], [0], [0], [1], [0, 0, 1, 1], [], []>} : vector<16x144xbf16>, vector<144x128xbf16>, vector<16x128xf32> -> vector<16x128xf32>
    %c0_3 = arith.constant 0 : index
    %c0_4 = arith.constant 0 : index
    %3 = vector.load %arg3[%c0_3, %c0_4] : memref<1x128xf32, #tpu.memory_space<vmem>>, vector<1x128xf32>
    %4 = vector.broadcast %3 : vector<1x128xf32> to vector<16x128xf32>
    %5 = arith.mulf %2, %4 : vector<16x128xf32>
    %c0_5 = arith.constant 0 : index
    %c0_6 = arith.constant 0 : index
    %6 = vector.load %arg4[%c0_5, %c0_6] : memref<1x128xf32, #tpu.memory_space<vmem>>, vector<1x128xf32>
    %7 = vector.broadcast %6 : vector<1x128xf32> to vector<16x128xf32>
    %8 = arith.addf %5, %7 : vector<16x128xf32>
    %cst_7 = arith.constant 0.000000e+00 : f32
    %9 = vector.broadcast %cst_7 : f32 to vector<16x128xf32>
    %10 = arith.cmpf ogt, %8, %9 : vector<16x128xf32>
    %cst_8 = arith.constant 2.000000e-01 : f32
    %11 = vector.broadcast %cst_8 : f32 to vector<16x128xf32>
    %12 = arith.mulf %11, %8 : vector<16x128xf32>
    %13 = arith.select %10, %8, %12 : vector<16x128xi1>, vector<16x128xf32>
    %14 = arith.truncf %13 : vector<16x128xf32> to vector<16x128xbf16>
    %c0_9 = arith.constant 0 : index
    %c0_10 = arith.constant 0 : index
    %15 = vector.load %arg5[%c0_9, %c0_10] : memref<16x128xbf16, #tpu.memory_space<vmem>>, vector<16x128xbf16>
    tpu.vector_store %arg5[%c0_9, %c0_10], %14 {strides = array<i32>} : memref<16x128xbf16, #tpu.memory_space<vmem>>, vector<16x128xbf16>,
    return
  }
  func.func @transform_0(%arg0: i32) -> (i32, i32) {
    %c0_i32 = arith.constant 0 : i32
    %c0_i32_0 = arith.constant 0 : i32
    return %arg0, %c0_i32 : i32, i32
  }
  func.func @transform_1(%arg0: i32) -> (i32, i32) {
    %c0_i32 = arith.constant 0 : i32
    %c0_i32_0 = arith.constant 0 : i32
    %c0_i32_1 = arith.constant 0 : i32
    return %c0_i32, %c0_i32_0 : i32, i32
  }
  func.func @transform_2(%arg0: i32) -> (i32, i32) {
    %c0_i32 = arith.constant 0 : i32
    %c0_i32_0 = arith.constant 0 : i32
    %c0_i32_1 = arith.constant 0 : i32
    return %c0_i32, %c0_i32_0 : i32, i32
  }
  func.func @transform_3(%arg0: i32) -> (i32, i32) {
    %c0_i32 = arith.constant 0 : i32
    %c0_i32_0 = arith.constant 0 : i32
    %c0_i32_1 = arith.constant 0 : i32
    return %c0_i32, %c0_i32_0 : i32, i32
  }
  func.func @transform_4(%arg0: i32) -> (i32, i32) {
    %c0_i32 = arith.constant 0 : i32
    %c0_i32_0 = arith.constant 0 : i32
    return %arg0, %c0_i32 : i32, i32
  }
}

module attributes {stable_mosaic.version = 11 : i64} {
  func.func @_fused_matmul_kernel(%arg0: i32, %arg1: memref<16x360xbf16, #tpu.memory_space<vmem>>, %arg2: memref<360x128xbf16, #tpu.memory_space<vmem>>, %arg3: memref<1x128xf32, #tpu.memory_space<vmem>>, %arg4: memref<1x128xf32, #tpu.memory_space<vmem>>, %arg5: memref<16x128xbf16, #tpu.memory_space<vmem>>) attributes {dimension_semantics = [#tpu.dimension_semantics<parallel>], iteration_bounds = array<i64: 2>, scalar_prefetch = 0 : i64, scratch_operands = 0 : i64, tpu.core_type = #tpu.core_type<tc>, window_params = [{transform_indices = @transform_0, window_bounds = array<i64: 16, 360>}, {pipeline_mode = #tpu.pipeline_mode<synchronous>, transform_indices = @transform_1, window_bounds = array<i64: 360, 128>}, {pipeline_mode = #tpu.pipeline_mode<synchronous>, transform_indices = @transform_2, window_bounds = array<i64: 1, 128>}, {pipeline_mode = #tpu.pipeline_mode<synchronous>, transform_indices = @transform_3, window_bounds = array<i64: 1, 128>}, {transform_indices = @transform_4, window_bounds = array<i64: 16, 128>}]} {
    %c0 = arith.constant 0 : index
    %c0_0 = arith.constant 0 : index
    %0 = vector.load %arg1[%c0, %c0_0] : memref<16x360xbf16, #tpu.memory_space<vmem>>, vector<16x360xbf16>
    %c0_1 = arith.constant 0 : index
    %c0_2 = arith.constant 0 : index
    %1 = vector.load %arg2[%c0_1, %c0_2] : memref<360x128xbf16, #tpu.memory_space<vmem>>, vector<360x128xbf16>
    %cst = arith.constant dense<0.000000e+00> : vector<16x128xf32>
    %2 = tpu.matmul %0, %1, %cst {dimension_numbers = #tpu.dot_dimension_numbers<[1], [0], [0], [1], [0, 0, 1, 1], [], []>} : vector<16x360xbf16>, vector<360x128xbf16>, vector<16x128xf32> -> vector<16x128xf32>
    %c0_3 = arith.constant 0 : index
    %c0_4 = arith.constant 0 : index
    %3 = vector.load %arg3[%c0_3, %c0_4] : memref<1x128xf32, #tpu.memory_space<vmem>>, vector<1x128xf32>
    %4 = vector.broadcast %3 : vector<1x128xf32> to vector<16x128xf32>
    %5 = arith.mulf %2, %4 : vector<16x128xf32>
    %c0_5 = arith.constant 0 : index
    %c0_6 = arith.constant 0 : index
    %6 = vector.load %arg4[%c0_5, %c0_6] : memref<1x128xf32, #tpu.memory_space<vmem>>, vector<1x128xf32>
    %7 = vector.broadcast %6 : vector<1x128xf32> to vector<16x128xf32>
    %8 = arith.addf %5, %7 : vector<16x128xf32>
    %cst_7 = arith.constant 0.000000e+00 : f32
    %9 = vector.broadcast %cst_7 : f32 to vector<16x128xf32>
    %10 = arith.cmpf ogt, %8, %9 : vector<16x128xf32>
    %cst_8 = arith.constant 2.000000e-01 : f32
    %11 = vector.broadcast %cst_8 : f32 to vector<16x128xf32>
    %12 = arith.mulf %11, %8 : vector<16x128xf32>
    %13 = arith.select %10, %8, %12 : vector<16x128xi1>, vector<16x128xf32>
    %14 = arith.truncf %13 : vector<16x128xf32> to vector<16x128xbf16>
    %c0_9 = arith.constant 0 : index
    %c0_10 = arith.constant 0 : index
    %15 = vector.load %arg5[%c0_9, %c0_10] : memref<16x128xbf16, #tpu.memory_space<vmem>>, vector<16x128xbf16>
    tpu.vector_store %arg5[%c0_9, %c0_10], %14 {strides = array<i32>} : memref<16x128xbf16, #tpu.memory_space<vmem>>, vector<16x128xbf16>,
    return
  }
  func.func @transform_0(%arg0: i32) -> (i32, i32) {
    %c0_i32 = arith.constant 0 : i32
    %c0_i32_0 = arith.constant 0 : i32
    return %arg0, %c0_i32 : i32, i32
  }
  func.func @transform_1(%arg0: i32) -> (i32, i32) {
    %c0_i32 = arith.constant 0 : i32
    %c0_i32_0 = arith.constant 0 : i32
    %c0_i32_1 = arith.constant 0 : i32
    return %c0_i32, %c0_i32_0 : i32, i32
  }
  func.func @transform_2(%arg0: i32) -> (i32, i32) {
    %c0_i32 = arith.constant 0 : i32
    %c0_i32_0 = arith.constant 0 : i32
    %c0_i32_1 = arith.constant 0 : i32
    return %c0_i32, %c0_i32_0 : i32, i32
  }
  func.func @transform_3(%arg0: i32) -> (i32, i32) {
    %c0_i32 = arith.constant 0 : i32
    %c0_i32_0 = arith.constant 0 : i32
    %c0_i32_1 = arith.constant 0 : i32
    return %c0_i32, %c0_i32_0 : i32, i32
  }
  func.func @transform_4(%arg0: i32) -> (i32, i32) {
    %c0_i32 = arith.constant 0 : i32
    %c0_i32_0 = arith.constant 0 : i32
    return %arg0, %c0_i32 : i32, i32
  }
}

module attributes {stable_mosaic.version = 11 : i64} {
  func.func @_fused_matmul_kernel(%arg0: i32, %arg1: memref<4x512xbf16, #tpu.memory_space<vmem>>, %arg2: memref<512x128xbf16, #tpu.memory_space<vmem>>, %arg3: memref<1x128xf32, #tpu.memory_space<vmem>>, %arg4: memref<1x128xf32, #tpu.memory_space<vmem>>, %arg5: memref<4x128xf32, #tpu.memory_space<vmem>>) attributes {dimension_semantics = [#tpu.dimension_semantics<parallel>], iteration_bounds = array<i64: 1>, scalar_prefetch = 0 : i64, scratch_operands = 0 : i64, tpu.core_type = #tpu.core_type<tc>, window_params = [{transform_indices = @transform_0, window_bounds = array<i64: 4, 512>}, {pipeline_mode = #tpu.pipeline_mode<synchronous>, transform_indices = @transform_1, window_bounds = array<i64: 512, 128>}, {pipeline_mode = #tpu.pipeline_mode<synchronous>, transform_indices = @transform_2, window_bounds = array<i64: 1, 128>}, {pipeline_mode = #tpu.pipeline_mode<synchronous>, transform_indices = @transform_3, window_bounds = array<i64: 1, 128>}, {transform_indices = @transform_4, window_bounds = array<i64: 4, 128>}]} {
    %c0 = arith.constant 0 : index
    %c0_0 = arith.constant 0 : index
    %0 = vector.load %arg1[%c0, %c0_0] : memref<4x512xbf16, #tpu.memory_space<vmem>>, vector<4x512xbf16>
    %c0_1 = arith.constant 0 : index
    %c0_2 = arith.constant 0 : index
    %1 = vector.load %arg2[%c0_1, %c0_2] : memref<512x128xbf16, #tpu.memory_space<vmem>>, vector<512x128xbf16>
    %cst = arith.constant dense<0.000000e+00> : vector<4x128xf32>
    %2 = tpu.matmul %0, %1, %cst {dimension_numbers = #tpu.dot_dimension_numbers<[1], [0], [0], [1], [0, 0, 1, 1], [], []>} : vector<4x512xbf16>, vector<512x128xbf16>, vector<4x128xf32> -> vector<4x128xf32>
    %c0_3 = arith.constant 0 : index
    %c0_4 = arith.constant 0 : index
    %3 = vector.load %arg3[%c0_3, %c0_4] : memref<1x128xf32, #tpu.memory_space<vmem>>, vector<1x128xf32>
    %4 = vector.broadcast %3 : vector<1x128xf32> to vector<4x128xf32>
    %5 = arith.mulf %2, %4 : vector<4x128xf32>
    %c0_5 = arith.constant 0 : index
    %c0_6 = arith.constant 0 : index
    %6 = vector.load %arg4[%c0_5, %c0_6] : memref<1x128xf32, #tpu.memory_space<vmem>>, vector<1x128xf32>
    %7 = vector.broadcast %6 : vector<1x128xf32> to vector<4x128xf32>
    %8 = arith.addf %5, %7 : vector<4x128xf32>
    %cst_7 = arith.constant 0.000000e+00 : f32
    %9 = vector.broadcast %cst_7 : f32 to vector<4x128xf32>
    %10 = arith.subf %9, %8 : vector<4x128xf32>
    %11 = math.exp %10 : vector<4x128xf32>
    %cst_8 = arith.constant 1.000000e+00 : f32
    %12 = vector.broadcast %cst_8 : f32 to vector<4x128xf32>
    %13 = arith.addf %12, %11 : vector<4x128xf32>
    %14 = tpu.reciprocal %13 {approx = true} : vector<4x128xf32> -> vector<4x128xf32>
    %c0_9 = arith.constant 0 : index
    %c0_10 = arith.constant 0 : index
    %15 = vector.load %arg5[%c0_9, %c0_10] : memref<4x128xf32, #tpu.memory_space<vmem>>, vector<4x128xf32>
    tpu.vector_store %arg5[%c0_9, %c0_10], %14 {strides = array<i32>} : memref<4x128xf32, #tpu.memory_space<vmem>>, vector<4x128xf32>,
    return
  }
  func.func @transform_0(%arg0: i32) -> (i32, i32) {
    %c0_i32 = arith.constant 0 : i32
    %c0_i32_0 = arith.constant 0 : i32
    return %arg0, %c0_i32 : i32, i32
  }
  func.func @transform_1(%arg0: i32) -> (i32, i32) {
    %c0_i32 = arith.constant 0 : i32
    %c0_i32_0 = arith.constant 0 : i32
    %c0_i32_1 = arith.constant 0 : i32
    return %c0_i32, %c0_i32_0 : i32, i32
  }
  func.func @transform_2(%arg0: i32) -> (i32, i32) {
    %c0_i32 = arith.constant 0 : i32
    %c0_i32_0 = arith.constant 0 : i32
    %c0_i32_1 = arith.constant 0 : i32
    return %c0_i32, %c0_i32_0 : i32, i32
  }
  func.func @transform_3(%arg0: i32) -> (i32, i32) {
    %c0_i32 = arith.constant 0 : i32
    %c0_i32_0 = arith.constant 0 : i32
    %c0_i32_1 = arith.constant 0 : i32
    return %c0_i32, %c0_i32_0 : i32, i32
  }
  func.func @transform_4(%arg0: i32) -> (i32, i32) {
    %c0_i32 = arith.constant 0 : i32
    %c0_i32_0 = arith.constant 0 : i32
    return %arg0, %c0_i32 : i32, i32
  }
}

</mosaic_0001>

<bundles_post_ra>
// kernel: d_net32_forward.6
= control target key start
LH: loop header
LB: loop body
LE: loop exit
PB: predicated region body
PF: predicated region fallthrough
CT: control target
= control target key end

     0   :  { %s1268_s15 = smov 0   ;;  %s1430_s0 = inlined_call_operand.vmem [shape: bf16[512,48], index: 0, kind: input, shape index: {}]   ;;  %s1431_s1 = inlined_call_operand.vmem [shape: bf16[48,128], index: 1, kind: input, shape index: {}]   ;;  %s1432_s2 = inlined_call_operand.vmem [shape: f32[1,128], index: 2, kind: input, shape index: {}]   ;;  %s1433_s3 = inlined_call_operand.vmem [shape: f32[1,128], index: 3, kind: input, shape index: {}]   ;;  %s1434_s4 = inlined_call_operand.vmem [shape: bf16[512,128], index: 4, kind: output, shape index: {}]  }
   0x1 LB: > { %s938_s16 = sadd.s32 4294967295, %s1241_s15   ;;  %p942_p0 = scmp.ge.s32.totalorder %s1241_s15, 1  ;;  %s1241_s15 = sphi %s1268_s15, %s14_s15  }
   0x2   : > { %p163_p1 = scmp.lt.s32.totalorder %s1241_s15, 3 }
   0x4   : > { %p164_p2 = pnand %p942_p0, %p163_p1 }
   0x5   : > { %v1216_v0 = vld [vmem:[%s1431_s1] sm:$0xff] (!%p164_p2)   ;;  %s943_s19 = sshll.u32 (!%p164_p2), %s938_s16, 5  ;;  %v1217_v1 = vld [vmem:[%s1431_s1 + $0x8] sm:$0xff] (!%p164_p2)   ;;  %v1218_v2 = vld [vmem:[%s1431_s1 + $0x10] sm:$0xff] (!%p164_p2)   ;;  %vm338_vm0 = vcmask (!%p164_p2), 392192  }
   0x6   : > { %167 = sbr.rel (%p164_p2) target bundleno = 280 (0x118), region = 36  ;;  %p190_p3 = scmp.lt.s32.totalorder (!%p164_p2), %s943_s19, 63  ;;  %1164 = vmatprep.subr.bf16.mxu0 (!%p164_p2), %v1216_v0  ;;  %1202 = vmatprep.subr.bf16.mxu1 (!%p164_p2), %v1216_v0  ;;  %v1330_v19 = vld [vmem:[%s1432_s2] ss:$0 sm:$0xff] (!%p164_p2) }
   0x7   : > { %1165 = vmatpush3.bf16.msra.mxu0 (!%p164_p2), %v1216_v0  ;;  %1205 = vmatpush3.bf16.msra.mxu1 (!%p164_p2), %v1216_v0  ;;  %v1335_v21 = vld [vmem:[%s1433_s3] ss:$0 sm:$0xff] (!%p164_p2) }
   0x8   : > { %1166 = vmatprep.subr.bf16.mxu0 (!%p164_p2), %v1217_v1  ;;  %1203 = vmatprep.subr.bf16.mxu1 (!%p164_p2), %v1217_v1 }
   0xb   : > { %1167 = vmatpush3.bf16.msra.mxu0 (!%p164_p2), %v1217_v1  ;;  %1206 = vmatpush3.bf16.msra.mxu1 (!%p164_p2), %v1217_v1 }
   0xc   : > { %1168 = vmatprep.subr.bf16.mxu0 (!%p164_p2), %v1218_v2  ;;  %1204 = vmatprep.subr.bf16.mxu1 (!%p164_p2), %v1218_v2 }
   0xd   : > { %s1436_s19 = smov (!%p190_p3, %s943_s19), 63 }
   0xe   : > { %s944_s24 = sshll.u32 %s1436_s19, 2 }
   0xf   : > { %s1293_s27 = scalar_lea.vmem %s1430_s0, %s944_s24  ;;  %1169 = vmatpush3.bf16.msra.mxu0 %v1218_v2  ;;  %1207 = vmatpush3.bf16.msra.mxu1 %v1218_v2  ;;  %s1358_s8 = scalar_lea.vmem %s1434_s4, %s944_s24 }
  0x10   : > { %v1219_v3 = vld [vmem:[%s1293_s27] sm:$0xff]   ;;  %v1221_v5 = vld [vmem:[%s1293_s27 + $0x8] sm:$0xff]   ;;  %v1223_v7 = vld [vmem:[%s1293_s27 + $0x10] sm:$0xff]  }
  0x11   : > { %v1220_v4 = vld [vmem:[%s1293_s27 + $0x40] sm:$0xff]   ;;  %1170 = vmatprep.mubr.msk.bf16.mxu0 %vm338_vm0, %v1219_v3  ;;  %v1222_v6 = vld [vmem:[%s1293_s27 + $0x48] sm:$0xff]   ;;  %v1224_v8 = vld [vmem:[%s1293_s27 + $0x50] sm:$0xff]  }
  0x12   : > { %1186 = vmatprep.mubr.msk.bf16.mxu1 %vm338_vm0, %v1220_v4  ;;  %1171 = vmatmul.mubr.msk.bf16.vlgmr.msra.gmra.mrb[0].mxu0 %vm338_vm0, %v1221_v5  ;;  %v1225_v9 = vld [vmem:[%s1293_s27 + $0x18] sm:$0xff]   ;;  %v1227_v11 = vld [vmem:[%s1293_s27 + $0x20] sm:$0xff]   ;;  %v1229_v13 = vld [vmem:[%s1293_s27 + $0x28] sm:$0xff]  }
  0x13   : > { %1187 = vmatmul.mubr.msk.bf16.vlgmr.msra.gmra.mrb[0].mxu1 %vm338_vm0, %v1222_v6  ;;  %1174 = vmatprep.mubr.msk.bf16.mxu0 %vm338_vm0, %v1223_v7  ;;  %v1226_v10 = vld [vmem:[%s1293_s27 + $0x58] sm:$0xff]   ;;  %v1228_v12 = vld [vmem:[%s1293_s27 + $0x60] sm:$0xff]   ;;  %v1230_v14 = vld [vmem:[%s1293_s27 + $0x68] sm:$0xff]  }
  0x14   : > { %1190 = vmatprep.mubr.msk.bf16.mxu1 %vm338_vm0, %v1224_v8  ;;  %v1231_v15 = vld [vmem:[%s1293_s27 + $0x30] sm:$0xff]   ;;  %v1233_v17 = vld [vmem:[%s1293_s27 + $0x38] sm:$0xff]  }
  0x15   : > { %v1232_v16 = vld [vmem:[%s1293_s27 + $0x70] sm:$0xff]   ;;  %v1234_v18 = vld [vmem:[%s1293_s27 + $0x78] sm:$0xff]  }
  0x1a   : > { %1175 = vmatmul.mubr.msk.bf16.gmra.mrb[4].mxu0 %vm338_vm0, %v1225_v9 }
  0x1b   : > { %1191 = vmatmul.mubr.msk.bf16.gmra.mrb[4].mxu1 %vm338_vm0, %v1226_v10  ;;  %1178 = vmatprep.mubr.msk.bf16.mxu0 %vm338_vm0, %v1227_v11 }
  0x1c   : > { %1194 = vmatprep.mubr.msk.bf16.mxu1 %vm338_vm0, %v1228_v12 }
  0x22   : > { %1179 = vmatmul.mubr.msk.bf16.gmra.mrb[8].mxu0 %vm338_vm0, %v1229_v13 }
  0x23   : > { %1195 = vmatmul.mubr.msk.bf16.gmra.mrb[8].mxu1 %vm338_vm0, %v1230_v14  ;;  %1182 = vmatprep.mubr.msk.bf16.mxu0 %vm338_vm0, %v1231_v15 }
  0x24   : > { %1198 = vmatprep.mubr.msk.bf16.mxu1 %vm338_vm0, %v1232_v16 }
  0x2a   : > { %1183 = vmatmul.mubr.msk.bf16.gmra.mrb[12].mxu0 %vm338_vm0, %v1233_v17 }
  0x2b   : > { %1199 = vmatmul.mubr.msk.bf16.gmra.mrb[12].mxu1 %vm338_vm0, %v1234_v18 }
  0xe5   : > { %v1172_v20 = vpop.f32.mrb[0].mxu0 }
  0xe6   : > { %v1188_v22 = vpop.f32.mrb[0].mxu1  ;;  %v557_v23 = vmul.f32 %v1172_v20, %v1330_v19  ;;  %v421_v25 = vpop.f32.mrb[1].mxu0 }
  0xe7   : > { %v573_v24 = vmul.f32 %v1188_v22, %v1330_v19  ;;  %v485_v26 = vpop.f32.mrb[1].mxu1  ;;  %v555_v27 = vmul.f32 %v1330_v19, %v421_v25  ;;  %v1173_v29 = vpop.f32.mrb[2].mxu0 }
  0xe8   : > { %v571_v28 = vmul.f32 %v1330_v19, %v485_v26  ;;  %v1189_v30 = vpop.f32.mrb[2].mxu1  ;;  %v596_v31 = vadd.f32 %v1335_v21, %v557_v23  ;;  %v558_v33 = vmul.f32 %v1173_v29, %v1330_v19  ;;  %v424_v35 = vpop.f32.mrb[3].mxu0 }
  0xe9   : > { %v612_v32 = vadd.f32 %v1335_v21, %v573_v24  ;;  %v574_v34 = vmul.f32 %v1189_v30, %v1330_v19  ;;  %v488_v36 = vpop.f32.mrb[3].mxu1  ;;  %v594_v37 = vadd.f32 %v1335_v21, %v555_v27  ;;  %v556_v39 = vmul.f32 %v1330_v19, %v424_v35 }
  0xea   : > { %v610_v38 = vadd.f32 %v1335_v21, %v571_v28  ;;  %v572_v40 = vmul.f32 %v1330_v19, %v488_v36  ;;  %vm628_vm1 = vcmp.gt.f32.partialorder %v596_v31, 0.0  ;;  %v660_v41 = vmul.f32 0.2, %v596_v31 }
  0xeb   : > { %vm644_vm2 = vcmp.gt.f32.partialorder %v612_v32, 0.0  ;;  %v676_v42 = vmul.f32 0.2, %v612_v32  ;;  %vm626_vm3 = vcmp.gt.f32.partialorder %v594_v37, 0.0  ;;  %v658_v43 = vmul.f32 0.2, %v594_v37 }
  0xec   : > { %vm642_vm4 = vcmp.gt.f32.partialorder %v610_v38, 0.0  ;;  %v674_v44 = vmul.f32 0.2, %v610_v38  ;;  %v692_v45 = vsel %vm628_vm1, %v596_v31, %v660_v41  ;;  %v597_v47 = vadd.f32 %v1335_v21, %v558_v33 }
  0xed   : > { %v708_v46 = vsel %vm644_vm2, %v612_v32, %v676_v42  ;;  %v613_v48 = vadd.f32 %v1335_v21, %v574_v34  ;;  %v690_v49 = vsel %vm626_vm3, %v594_v37, %v658_v43  ;;  %v595_v51 = vadd.f32 %v1335_v21, %v556_v39  ;;  %v1176_v53 = vpop.f32.mrb[4].mxu0 }
  0xee   : > { %v706_v50 = vsel %vm642_vm4, %v610_v38, %v674_v44  ;;  %v611_v52 = vadd.f32 %v1335_v21, %v572_v40  ;;  %v1192_v54 = vpop.f32.mrb[4].mxu1  ;;  %vm629_vm5 = vcmp.gt.f32.partialorder %v597_v47, 0.0  ;;  %v661_v55 = vmul.f32 0.2, %v597_v47  ;;  %v437_v63 = vpop.f32.mrb[5].mxu0 }
  0xef   : > { %vm645_vm6 = vcmp.gt.f32.partialorder %v613_v48, 0.0  ;;  %v677_v56 = vmul.f32 0.2, %v613_v48  ;;  %vm627_vm7 = vcmp.gt.f32.partialorder %v595_v51, 0.0  ;;  %v659_v57 = vmul.f32 0.2, %v595_v51 }
  0xf0   : > { %vm643_vm8 = vcmp.gt.f32.partialorder %v611_v52, 0.0  ;;  %v675_v58 = vmul.f32 0.2, %v611_v52  ;;  %v693_v59 = vsel %vm629_vm5, %v597_v47, %v661_v55  ;;  %v561_v61 = vmul.f32 %v1176_v53, %v1330_v19  ;;  %v501_v0 = vpop.f32.mrb[5].mxu1  ;;  %v1177_v5 = vpop.f32.mrb[6].mxu0 }
  0xf1   : > { %v709_v60 = vsel %vm645_vm6, %v613_v48, %v677_v56  ;;  %v577_v62 = vmul.f32 %v1192_v54, %v1330_v19  ;;  %v1058_v1 = vpack.c.bf16 %v693_v59, %v692_v45  ;;  %v691_v3 = vsel %vm627_vm7, %v595_v51, %v659_v57  ;;  %v1193_v6 = vpop.f32.mrb[6].mxu1  ;;  %v440_v11 = vpop.f32.mrb[7].mxu0 }
  0xf2   : > { %v1098_v2 = vpack.c.bf16 %v709_v60, %v708_v46  ;;  %v707_v4 = vsel %vm643_vm8, %v611_v52, %v675_v58  ;;  %v1053_v7 = vpack.c.bf16 %v691_v3, %v690_v49  ;;  %v600_v9 = vadd.f32 %v1335_v21, %v561_v61  ;;  %v504_v12 = vpop.f32.mrb[7].mxu1 }
  0xf3   : > { %v1093_v8 = vpack.c.bf16 %v707_v4, %v706_v50  ;;  %v616_v10 = vadd.f32 %v1335_v21, %v577_v62  ;;  %1130 = vst [vmem:[%s1358_s8 + $0x8] sm:$0xff] %v1058_v1   ;;  %v559_v13 = vmul.f32 %v1330_v19, %v437_v63  ;;  %v575_v14 = vmul.f32 %v1330_v19, %v501_v0 }
  0xf4   : > { %1138 = vst [vmem:[%s1358_s8 + $0x48] sm:$0xff] %v1098_v2   ;;  %v562_v15 = vmul.f32 %v1177_v5, %v1330_v19  ;;  %v578_v16 = vmul.f32 %v1193_v6, %v1330_v19  ;;  %1054 = vst [vmem:[%s1358_s8] sm:$0xff] %v1053_v7   ;;  %vm632_vm9 = vcmp.gt.f32.partialorder %v600_v9, 0.0  ;;  %v664_v17 = vmul.f32 0.2, %v600_v9 }
  0xf5   : > { %1137 = vst [vmem:[%s1358_s8 + $0x40] sm:$0xff] %v1093_v8   ;;  %vm648_vm10 = vcmp.gt.f32.partialorder %v616_v10, 0.0  ;;  %v680_v18 = vmul.f32 0.2, %v616_v10  ;;  %v598_v20 = vadd.f32 %v1335_v21, %v559_v13  ;;  %v614_v22 = vadd.f32 %v1335_v21, %v575_v14  ;;  %v1180_v25 = vpop.f32.mrb[8].mxu0 }
  0xf6   : > { %v601_v23 = vadd.f32 %v1335_v21, %v562_v15  ;;  %v617_v24 = vadd.f32 %v1335_v21, %v578_v16  ;;  %v1196_v26 = vpop.f32.mrb[8].mxu1  ;;  %v696_v27 = vsel %vm632_vm9, %v600_v9, %v664_v17  ;;  %v560_v29 = vmul.f32 %v1330_v19, %v440_v11  ;;  %v453_v31 = vpop.f32.mrb[9].mxu0 }
  0xf7   : > { %v712_v28 = vsel %vm648_vm10, %v616_v10, %v680_v18  ;;  %v576_v30 = vmul.f32 %v1330_v19, %v504_v12  ;;  %v517_v32 = vpop.f32.mrb[9].mxu1  ;;  %vm630_vm11 = vcmp.gt.f32.partialorder %v598_v20, 0.0  ;;  %v662_v33 = vmul.f32 0.2, %v598_v20  ;;  %v1181_v41 = vpop.f32.mrb[10].mxu0 }
  0xf8   : > { %vm646_vm12 = vcmp.gt.f32.partialorder %v614_v22, 0.0  ;;  %v678_v34 = vmul.f32 0.2, %v614_v22  ;;  %vm633_vm13 = vcmp.gt.f32.partialorder %v601_v23, 0.0  ;;  %v665_v35 = vmul.f32 0.2, %v601_v23 }
  0xf9   : > { %vm649_vm14 = vcmp.gt.f32.partialorder %v617_v24, 0.0  ;;  %v681_v36 = vmul.f32 0.2, %v617_v24  ;;  %v694_v37 = vsel %vm630_vm11, %v598_v20, %v662_v33  ;;  %v599_v39 = vadd.f32 %v1335_v21, %v560_v29  ;;  %v1197_v42 = vpop.f32.mrb[10].mxu1  ;;  %v456_v47 = vpop.f32.mrb[11].mxu0 }
  0xfa   : > { %v710_v38 = vsel %vm646_vm12, %v614_v22, %v678_v34  ;;  %v615_v40 = vadd.f32 %v1335_v21, %v576_v30  ;;  %v697_v43 = vsel %vm633_vm13, %v601_v23, %v665_v35  ;;  %v565_v45 = vmul.f32 %v1180_v25, %v1330_v19  ;;  %v520_v48 = vpop.f32.mrb[11].mxu1 }
  0xfb   : > { %v713_v44 = vsel %vm649_vm14, %v617_v24, %v681_v36  ;;  %v581_v46 = vmul.f32 %v1196_v26, %v1330_v19  ;;  %v1068_v49 = vpack.c.bf16 %v697_v43, %v696_v27  ;;  %vm631_vm15 = vcmp.gt.f32.partialorder %v599_v39, 0.0 }
  0xfc   : > { %v1108_v50 = vpack.c.bf16 %v713_v44, %v712_v28  ;;  %v663_v51 = vmul.f32 0.2, %v599_v39  ;;  %vm647_vm0 = vcmp.gt.f32.partialorder %v615_v40, 0.0  ;;  %v679_v52 = vmul.f32 0.2, %v615_v40 }
  0xfd   : > { %v604_v53 = vadd.f32 %v1335_v21, %v565_v45  ;;  %v620_v54 = vadd.f32 %v1335_v21, %v581_v46  ;;  %1132 = vst [vmem:[%s1358_s8 + $0x18] sm:$0xff] %v1068_v49   ;;  %v563_v56 = vmul.f32 %v1330_v19, %v453_v31  ;;  %v579_v57 = vmul.f32 %v1330_v19, %v517_v32  ;;  %v1184_v59 = vpop.f32.mrb[12].mxu0 }
  0xfe   : > { %1140 = vst [vmem:[%s1358_s8 + $0x58] sm:$0xff] %v1108_v50   ;;  %v695_v55 = vsel %vm631_vm15, %v599_v39, %v663_v51  ;;  %v566_v58 = vmul.f32 %v1181_v41, %v1330_v19  ;;  %v1200_v60 = vpop.f32.mrb[12].mxu1  ;;  %v711_v62 = vsel %vm647_vm0, %v615_v40, %v679_v52  ;;  %v469_v0 = vpop.f32.mrb[13].mxu0  ;;  %v582_v9 = vmul.f32 %v1197_v42, %v1330_v19 }
  0xff   : > { %v1063_v61 = vpack.c.bf16 %v695_v55, %v694_v37  ;;  %vm636_vm1 = vcmp.gt.f32.partialorder %v604_v53, 0.0  ;;  %v668_v63 = vmul.f32 0.2, %v604_v53  ;;  %v533_v1 = vpop.f32.mrb[13].mxu1  ;;  %v1103_v2 = vpack.c.bf16 %v711_v62, %v710_v38  ;;  %v1185_v5 = vpop.f32.mrb[14].mxu0 }
 0x100   : > { %vm652_vm2 = vcmp.gt.f32.partialorder %v620_v54, 0.0  ;;  %v684_v3 = vmul.f32 0.2, %v620_v54  ;;  %v602_v4 = vadd.f32 %v1335_v21, %v563_v56  ;;  %v1201_v6 = vpop.f32.mrb[14].mxu1  ;;  %v618_v7 = vadd.f32 %v1335_v21, %v579_v57  ;;  %v472_v10 = vpop.f32.mrb[15].mxu0 }
 0x101   : > { %1131 = vst [vmem:[%s1358_s8 + $0x10] sm:$0xff] %v1063_v61   ;;  %v605_v8 = vadd.f32 %v1335_v21, %v566_v58  ;;  %v536_v11 = vpop.f32.mrb[15].mxu1  ;;  %1139 = vst [vmem:[%s1358_s8 + $0x50] sm:$0xff] %v1103_v2   ;;  %v700_v12 = vsel %vm636_vm1, %v604_v53, %v668_v63  ;;  %v564_v14 = vmul.f32 %v1330_v19, %v456_v47 }
 0x102   : > { %v716_v13 = vsel %vm652_vm2, %v620_v54, %v684_v3  ;;  %vm634_vm3 = vcmp.gt.f32.partialorder %v602_v4, 0.0  ;;  %v666_v15 = vmul.f32 0.2, %v602_v4  ;;  %vm650_vm5 = vcmp.gt.f32.partialorder %v618_v7, 0.0 }
 0x103   : > { %vm637_vm4 = vcmp.gt.f32.partialorder %v605_v8, 0.0  ;;  %v669_v16 = vmul.f32 0.2, %v605_v8  ;;  %v621_v17 = vadd.f32 %v1335_v21, %v582_v9  ;;  %v603_v18 = vadd.f32 %v1335_v21, %v564_v14 }
 0x104   : > { %v580_v20 = vmul.f32 %v1330_v19, %v520_v48  ;;  %v682_v22 = vmul.f32 0.2, %v618_v7  ;;  %v569_v24 = vmul.f32 %v1184_v59, %v1330_v19  ;;  %v585_v25 = vmul.f32 %v1200_v60, %v1330_v19 }
 0x105   : > { %v701_v23 = vsel %vm637_vm4, %v605_v8, %v669_v16  ;;  %vm653_vm6 = vcmp.gt.f32.partialorder %v621_v17, 0.0  ;;  %v685_v27 = vmul.f32 0.2, %v621_v17  ;;  %vm635_vm7 = vcmp.gt.f32.partialorder %v603_v18, 0.0 }
 0x106   : > { %v1078_v26 = vpack.c.bf16 %v701_v23, %v700_v12  ;;  %v698_v28 = vsel %vm634_vm3, %v602_v4, %v666_v15  ;;  %v667_v29 = vmul.f32 0.2, %v603_v18  ;;  %v619_v30 = vadd.f32 %v1335_v21, %v580_v20 }
 0x107   : > { %v608_v31 = vadd.f32 %v1335_v21, %v569_v24  ;;  %v717_v32 = vsel %vm653_vm6, %v621_v17, %v685_v27  ;;  %v624_v33 = vadd.f32 %v1335_v21, %v585_v25  ;;  %v567_v34 = vmul.f32 %v1330_v19, %v469_v0 }
 0x108   : > { %1134 = vst [vmem:[%s1358_s8 + $0x28] sm:$0xff] %v1078_v26   ;;  %v570_v35 = vmul.f32 %v1185_v5, %v1330_v19  ;;  %v1118_v36 = vpack.c.bf16 %v717_v32, %v716_v13  ;;  %v699_v37 = vsel %vm635_vm7, %v603_v18, %v667_v29  ;;  %vm651_vm8 = vcmp.gt.f32.partialorder %v619_v30, 0.0 }
 0x109   : > { %v683_v38 = vmul.f32 0.2, %v619_v30  ;;  %v1073_v39 = vpack.c.bf16 %v699_v37, %v698_v28  ;;  %v583_v40 = vmul.f32 %v1330_v19, %v533_v1  ;;  %v714_v41 = vsel %vm650_vm5, %v618_v7, %v682_v22 }
 0x10a   : > { %1142 = vst [vmem:[%s1358_s8 + $0x68] sm:$0xff] %v1118_v36   ;;  %vm640_vm9 = vcmp.gt.f32.partialorder %v608_v31, 0.0  ;;  %v672_v43 = vmul.f32 0.2, %v608_v31  ;;  %v688_v45 = vmul.f32 0.2, %v624_v33  ;;  %v609_v46 = vadd.f32 %v1335_v21, %v570_v35 }
 0x10b   : > { %v715_v42 = vsel %vm651_vm8, %v619_v30, %v683_v38  ;;  %1133 = vst [vmem:[%s1358_s8 + $0x20] sm:$0xff] %v1073_v39   ;;  %v586_v47 = vmul.f32 %v1201_v6, %v1330_v19  ;;  %vm656_vm10 = vcmp.gt.f32.partialorder %v624_v33, 0.0  ;;  %v606_v48 = vadd.f32 %v1335_v21, %v567_v34 }
 0x10c   : > { %v1113_v44 = vpack.c.bf16 %v715_v42, %v714_v41  ;;  %v622_v49 = vadd.f32 %v1335_v21, %v583_v40  ;;  %vm641_vm11 = vcmp.gt.f32.partialorder %v609_v46, 0.0  ;;  %v673_v50 = vmul.f32 0.2, %v609_v46 }
 0x10d   : > { %v625_v51 = vadd.f32 %v1335_v21, %v586_v47  ;;  %v704_v52 = vsel %vm640_vm9, %v608_v31, %v672_v43  ;;  %v568_v53 = vmul.f32 %v1330_v19, %v472_v10  ;;  %v584_v54 = vmul.f32 %v1330_v19, %v536_v11 }
 0x10e   : > { %1141 = vst [vmem:[%s1358_s8 + $0x60] sm:$0xff] %v1113_v44   ;;  %v720_v55 = vsel %vm656_vm10, %v624_v33, %v688_v45  ;;  %v705_v56 = vsel %vm641_vm11, %v609_v46, %v673_v50  ;;  %v670_v58 = vmul.f32 0.2, %v606_v48  ;;  %vm638_vm13 = vcmp.gt.f32.partialorder %v606_v48, 0.0 }
 0x10f   : > { %vm657_vm12 = vcmp.gt.f32.partialorder %v625_v51, 0.0  ;;  %v689_v57 = vmul.f32 0.2, %v625_v51  ;;  %v1088_v59 = vpack.c.bf16 %v705_v56, %v704_v52  ;;  %v607_v60 = vadd.f32 %v1335_v21, %v568_v53 }
 0x110   : > { %v623_v61 = vadd.f32 %v1335_v21, %v584_v54  ;;  %vm654_vm14 = vcmp.gt.f32.partialorder %v622_v49, 0.0  ;;  %v686_v62 = vmul.f32 0.2, %v622_v49  ;;  %v702_v2 = vsel %vm638_vm13, %v606_v48, %v670_v58 }
 0x111   : > { %v721_v63 = vsel %vm657_vm12, %v625_v51, %v689_v57  ;;  %1136 = vst [vmem:[%s1358_s8 + $0x38] sm:$0xff] %v1088_v59   ;;  %vm639_vm15 = vcmp.gt.f32.partialorder %v607_v60, 0.0  ;;  %v671_v19 = vmul.f32 0.2, %v607_v60 }
 0x112   : > { %v1128_v0 = vpack.c.bf16 %v721_v63, %v720_v55  ;;  %vm655_vm0 = vcmp.gt.f32.partialorder %v623_v61, 0.0  ;;  %v687_v1 = vmul.f32 0.2, %v623_v61  ;;  %v718_v4 = vsel %vm654_vm14, %v622_v49, %v686_v62 }
 0x113   : > { %v703_v3 = vsel %vm639_vm15, %v607_v60, %v671_v19 }
 0x114   : > { %1144 = vst [vmem:[%s1358_s8 + $0x78] sm:$0xff] %v1128_v0   ;;  %v1083_v5 = vpack.c.bf16 %v703_v3, %v702_v2  ;;  %v719_v6 = vsel %vm655_vm0, %v623_v61, %v687_v1 }
 0x115   : > { %v1123_v7 = vpack.c.bf16 %v719_v6, %v718_v4 }
 0x116   : > { %1135 = vst [vmem:[%s1358_s8 + $0x30] sm:$0xff] %v1083_v5  }
 0x117   : > { %1143 = vst [vmem:[%s1358_s8 + $0x70] sm:$0xff] %v1123_v7  }
 0x118 PF: > { %s14_s15 = sadd.s32 1, %s1241_s15  }
 0x119   : > { %p11_p4 = scmp.ge.s32.totalorder %s14_s15, 4  }
 0x11b   :  { %13 = sbr.rel (!%p11_p4) target bundleno = 1 (0x1), region = 66 }

// kernel: d_net32_forward.7
= control target key start
LH: loop header
LB: loop body
LE: loop exit
PB: predicated region body
PF: predicated region fallthrough
CT: control target
= control target key end

     0   :  { %s635_s15 = smov 0   ;;  %s683_s0 = inlined_call_operand.vmem [shape: bf16[128,64], index: 0, kind: input, shape index: {}]   ;;  %s684_s1 = inlined_call_operand.vmem [shape: bf16[64,128], index: 1, kind: input, shape index: {}]   ;;  %s685_s2 = inlined_call_operand.vmem [shape: f32[1,128], index: 2, kind: input, shape index: {}]   ;;  %s686_s3 = inlined_call_operand.vmem [shape: f32[1,128], index: 3, kind: input, shape index: {}]   ;;  %s687_s4 = inlined_call_operand.vmem [shape: bf16[128,128], index: 4, kind: output, shape index: {}]  }
   0x1 LB: > { %s490_s16 = sadd.s32 4294967295, %s608_s15   ;;  %p494_p0 = scmp.ge.s32.totalorder %s608_s15, 1  ;;  %s608_s15 = sphi %s635_s15, %s14_s15  }
   0x2   : > { %p163_p1 = scmp.lt.s32.totalorder %s608_s15, 3 }
   0x4   : > { %p164_p2 = pnand %p494_p0, %p163_p1 }
   0x5   : > { %v594_v0 = vld [vmem:[%s684_s1] sm:$0xff] (!%p164_p2)   ;;  %s495_s19 = sshll.u32 (!%p164_p2), %s490_s16, 3  ;;  %v595_v1 = vld [vmem:[%s684_s1 + $0x8] sm:$0xff] (!%p164_p2)   ;;  %v596_v2 = vld [vmem:[%s684_s1 + $0x10] sm:$0xff] (!%p164_p2)   ;;  %vm262_vm0 = vcmask (!%p164_p2), 523264  }
   0x6   : > { %167 = sbr.rel (%p164_p2) target bundleno = 249 (0xf9), region = 36  ;;  %p190_p3 = scmp.lt.s32.totalorder (!%p164_p2), %s495_s19, 15  ;;  %562 = vmatprep.subr.bf16.mxu0 (!%p164_p2), %v594_v0  ;;  %578 = vmatprep.subr.bf16.mxu1 (!%p164_p2), %v594_v0  ;;  %v597_v3 = vld [vmem:[%s684_s1 + $0x18] sm:$0xff] (!%p164_p2)   ;;  %v511_v8 = vld [vmem:[%s685_s2] ss:$0 sm:$0xff] (!%p164_p2) }
   0x7   : > { %563 = vmatpush3.bf16.msra.mxu0 (!%p164_p2), %v594_v0  ;;  %582 = vmatpush3.bf16.msra.mxu1 (!%p164_p2), %v594_v0  ;;  %v512_v10 = vld [vmem:[%s686_s3] ss:$0 sm:$0xff] (!%p164_p2) }
   0x8   : > { %564 = vmatprep.subr.bf16.mxu0 (!%p164_p2), %v595_v1  ;;  %579 = vmatprep.subr.bf16.mxu1 (!%p164_p2), %v595_v1 }
   0xb   : > { %565 = vmatpush3.bf16.msra.mxu0 (!%p164_p2), %v595_v1  ;;  %583 = vmatpush3.bf16.msra.mxu1 (!%p164_p2), %v595_v1 }
   0xc   : > { %566 = vmatprep.subr.bf16.mxu0 (!%p164_p2), %v596_v2  ;;  %580 = vmatprep.subr.bf16.mxu1 (!%p164_p2), %v596_v2 }
   0xd   : > { %s689_s19 = smov (!%p190_p3, %s495_s19), 15 }
   0xe   : > { %s496_s24 = sshll.u32 %s689_s19, 2 }
   0xf   : > { %s193_s29 = scalar_lea.vmem %s683_s0, %s496_s24  ;;  %567 = vmatpush3.bf16.msra.mxu0 %v596_v2  ;;  %584 = vmatpush3.bf16.msra.mxu1 %v596_v2  ;;  %s199_s10 = scalar_lea.vmem %s687_s4, %s496_s24 }
  0x10   : > { %v598_v4 = vld [vmem:[%s193_s29] sm:$0xff]   ;;  %v599_v5 = vld [vmem:[%s193_s29 + $0x10] sm:$0xff]   ;;  %568 = vmatprep.subr.bf16.mxu0 %v597_v3  ;;  %581 = vmatprep.subr.bf16.mxu1 %v597_v3  ;;  %v600_v6 = vld [vmem:[%s193_s29 + $0x8] sm:$0xff]  }
  0x11   : > { %570 = vmatprep.mubr.msk.bf16.mxu0 %vm262_vm0, %v598_v4  ;;  %574 = vmatprep.mubr.msk.bf16.mxu1 %vm262_vm0, %v599_v5  ;;  %v601_v7 = vld [vmem:[%s193_s29 + $0x18] sm:$0xff]  }
  0x13   : > { %569 = vmatpush3.bf16.msra.mxu0 %v597_v3  ;;  %585 = vmatpush3.bf16.msra.mxu1 %v597_v3 }
  0x16   : > { %571 = vmatmul.mubr.msk.bf16.vlgmr.msra.gmra.mrb[0].mxu0 %vm262_vm0, %v600_v6  ;;  %575 = vmatmul.mubr.msk.bf16.vlgmr.msra.gmra.mrb[0].mxu1 %vm262_vm0, %v601_v7 }
  0xe9   : > { %v572_v9 = vpop.f32.mrb[0].mxu0  ;;  %v576_v11 = vpop.f32.mrb[0].mxu1 }
  0xea   : > { %v349_v12 = vmul.f32 %v572_v9, %v511_v8  ;;  %v353_v13 = vmul.f32 %v576_v11, %v511_v8  ;;  %v309_v14 = vpop.f32.mrb[1].mxu0  ;;  %v325_v15 = vpop.f32.mrb[1].mxu1 }
  0xeb   : > { %v347_v16 = vmul.f32 %v511_v8, %v309_v14  ;;  %v351_v17 = vmul.f32 %v511_v8, %v325_v15  ;;  %v573_v18 = vpop.f32.mrb[2].mxu0  ;;  %v577_v19 = vpop.f32.mrb[2].mxu1 }
  0xec   : > { %v364_v20 = vadd.f32 %v512_v10, %v349_v12  ;;  %v368_v21 = vadd.f32 %v512_v10, %v353_v13  ;;  %v350_v22 = vmul.f32 %v573_v18, %v511_v8  ;;  %v354_v23 = vmul.f32 %v577_v19, %v511_v8  ;;  %v312_v24 = vpop.f32.mrb[3].mxu0  ;;  %v328_v25 = vpop.f32.mrb[3].mxu1 }
  0xed   : > { %v362_v26 = vadd.f32 %v512_v10, %v347_v16  ;;  %v366_v27 = vadd.f32 %v512_v10, %v351_v17  ;;  %v348_v28 = vmul.f32 %v511_v8, %v312_v24  ;;  %v352_v29 = vmul.f32 %v511_v8, %v328_v25 }
  0xee   : > { %vm372_vm1 = vcmp.gt.f32.partialorder %v364_v20, 0.0  ;;  %v380_v30 = vmul.f32 0.2, %v364_v20  ;;  %vm376_vm2 = vcmp.gt.f32.partialorder %v368_v21, 0.0  ;;  %v384_v31 = vmul.f32 0.2, %v368_v21 }
  0xef   : > { %vm370_vm3 = vcmp.gt.f32.partialorder %v362_v26, 0.0  ;;  %v378_v32 = vmul.f32 0.2, %v362_v26  ;;  %vm374_vm4 = vcmp.gt.f32.partialorder %v366_v27, 0.0  ;;  %v382_v33 = vmul.f32 0.2, %v366_v27 }
  0xf0   : > { %v365_v34 = vadd.f32 %v512_v10, %v350_v22  ;;  %v369_v35 = vadd.f32 %v512_v10, %v354_v23  ;;  %v388_v36 = vsel %vm372_vm1, %v364_v20, %v380_v30  ;;  %v392_v37 = vsel %vm376_vm2, %v368_v21, %v384_v31 }
  0xf1   : > { %v363_v38 = vadd.f32 %v512_v10, %v348_v28  ;;  %v367_v39 = vadd.f32 %v512_v10, %v352_v29  ;;  %v386_v44 = vsel %vm370_vm3, %v362_v26, %v378_v32  ;;  %v390_v45 = vsel %vm374_vm4, %v366_v27, %v382_v33 }
  0xf2   : > { %vm373_vm5 = vcmp.gt.f32.partialorder %v365_v34, 0.0  ;;  %v381_v40 = vmul.f32 0.2, %v365_v34  ;;  %vm377_vm6 = vcmp.gt.f32.partialorder %v369_v35, 0.0  ;;  %v385_v41 = vmul.f32 0.2, %v369_v35 }
  0xf3   : > { %vm371_vm7 = vcmp.gt.f32.partialorder %v363_v38, 0.0  ;;  %v379_v42 = vmul.f32 0.2, %v363_v38  ;;  %vm375_vm8 = vcmp.gt.f32.partialorder %v367_v39, 0.0  ;;  %v383_v43 = vmul.f32 0.2, %v367_v39 }
  0xf4   : > { %v389_v46 = vsel %vm373_vm5, %v365_v34, %v381_v40  ;;  %v393_v47 = vsel %vm377_vm6, %v369_v35, %v385_v41 }
  0xf5   : > { %v539_v48 = vpack.c.bf16 %v389_v46, %v388_v36  ;;  %v549_v49 = vpack.c.bf16 %v393_v47, %v392_v37  ;;  %v387_v50 = vsel %vm371_vm7, %v363_v38, %v379_v42  ;;  %v391_v51 = vsel %vm375_vm8, %v367_v39, %v383_v43 }
  0xf6   : > { %v534_v52 = vpack.c.bf16 %v387_v50, %v386_v44  ;;  %v544_v53 = vpack.c.bf16 %v391_v51, %v390_v45 }
  0xf7   : > { %551 = vst [vmem:[%s199_s10 + $0x8] sm:$0xff] %v539_v48   ;;  %553 = vst [vmem:[%s199_s10 + $0x18] sm:$0xff] %v549_v49  }
  0xf8   : > { %535 = vst [vmem:[%s199_s10] sm:$0xff] %v534_v52   ;;  %552 = vst [vmem:[%s199_s10 + $0x10] sm:$0xff] %v544_v53  }
  0xf9 PF: > { %s14_s15 = sadd.s32 1, %s608_s15  }
  0xfa   : > { %p11_p4 = scmp.ge.s32.totalorder %s14_s15, 4  }
  0xfc   :  { %13 = sbr.rel (!%p11_p4) target bundleno = 1 (0x1), region = 66 }

// kernel: d_net32_forward.8
= control target key start
LH: loop header
LB: loop body
LE: loop exit
PB: predicated region body
PF: predicated region fallthrough
CT: control target
= control target key end

     0   :  { %s519_s15 = smov 0   ;;  %s573_s0 = inlined_call_operand.vmem [shape: bf16[32,128], index: 0, kind: input, shape index: {}]   ;;  %s574_s1 = inlined_call_operand.vmem [shape: bf16[128,128], index: 1, kind: input, shape index: {}]   ;;  %s575_s2 = inlined_call_operand.vmem [shape: f32[1,128], index: 2, kind: input, shape index: {}]   ;;  %s576_s3 = inlined_call_operand.vmem [shape: f32[1,128], index: 3, kind: input, shape index: {}]   ;;  %s577_s4 = inlined_call_operand.vmem [shape: bf16[32,128], index: 4, kind: output, shape index: {}]  }
   0x1 LB: > { %s405_s16 = sadd.s32 4294967295, %s490_s15   ;;  %p409_p0 = scmp.ge.s32.totalorder %s490_s15, 1  ;;  %s490_s15 = sphi %s519_s15, %s14_s15  }
   0x2   : > { %p163_p1 = scmp.lt.s32.totalorder %s490_s15, 3 }
   0x4   : > { %p164_p2 = pnand %p409_p0, %p163_p1 }
   0x5   : > { %v475_v0 = vld [vmem:[%s574_s1] sm:$0xff] (!%p164_p2)   ;;  %v492_v1 = vmov (!%p164_p2), 0.0   ;;  %v476_v2 = vld [vmem:[%s574_s1 + $0x8] sm:$0xff] (!%p164_p2)   ;;  %vm493_vm0 = vmmov (!%p164_p2), 0   ;;  %s410_s21 = sshll.u32 (!%p164_p2), %s405_s16, 1  ;;  %v477_v3 = vld [vmem:[%s574_s1 + $0x10] sm:$0xff] (!%p164_p2)  }
   0x6   : > { %167 = sbr.rel (%p164_p2) target bundleno = 262 (0x106), region = 36  ;;  %445 = vmatprep.subr.bf16.mxu0 (!%p164_p2), %v492_v1  ;;  %461 = vmatprep.mubr.msk.bf16.mxu0 (!%p164_p2), %vm493_vm0, %v492_v1  ;;  %p190_p3 = scmp.lt.s32.totalorder (!%p164_p2), %s410_s21, 3  ;;  %v478_v4 = vld [vmem:[%s574_s1 + $0x18] sm:$0xff] (!%p164_p2)   ;;  %v479_v5 = vld [vmem:[%s574_s1 + $0x20] sm:$0xff] (!%p164_p2)   ;;  %v480_v6 = vld [vmem:[%s574_s1 + $0x28] sm:$0xff] (!%p164_p2)  }
   0x7   : > { %446 = vmatpush3.bf16.msra.mxu0 (!%p164_p2), %v475_v0  ;;  %v481_v7 = vld [vmem:[%s574_s1 + $0x30] sm:$0xff] (!%p164_p2)   ;;  %v482_v8 = vld [vmem:[%s574_s1 + $0x38] sm:$0xff] (!%p164_p2)   ;;  %v423_v10 = vld [vmem:[%s575_s2] ss:$0 sm:$0xff] (!%p164_p2) }
   0x8   : > { %447 = vmatprep.subr.bf16.mxu0 (!%p164_p2), %v492_v1  ;;  %v424_v12 = vld [vmem:[%s576_s3] ss:$0 sm:$0xff] (!%p164_p2) }
   0xb   : > { %448 = vmatpush3.bf16.msra.mxu0 (!%p164_p2), %v476_v2 }
   0xc   : > { %449 = vmatprep.subr.bf16.mxu0 (!%p164_p2), %v492_v1 }
   0xd   : > { %s579_s21 = smov (!%p190_p3, %s410_s21), 3 }
   0xe   : > { %s411_s24 = sshll.u32 %s579_s21, 2 }
   0xf   : > { %s193_s27 = scalar_lea.vmem %s573_s0, %s411_s24  ;;  %450 = vmatpush3.bf16.msra.mxu0 %v477_v3  ;;  %s199_s19 = scalar_lea.vmem %s577_s4, %s411_s24 }
  0x10   : > { %451 = vmatprep.subr.bf16.mxu0 %v492_v1  ;;  %v483_v9 = vld [vmem:[%s193_s27] sm:$0xff]  }
  0x13   : > { %452 = vmatpush3.bf16.msra.mxu0 %v478_v4 }
  0x14   : > { %453 = vmatprep.subr.bf16.mxu0 %v492_v1 }
  0x17   : > { %454 = vmatpush3.bf16.msra.mxu0 %v479_v5 }
  0x18   : > { %455 = vmatprep.subr.bf16.mxu0 %v492_v1 }
  0x1b   : > { %456 = vmatpush3.bf16.msra.mxu0 %v480_v6 }
  0x1c   : > { %457 = vmatprep.subr.bf16.mxu0 %v492_v1 }
  0x1f   : > { %458 = vmatpush3.bf16.msra.mxu0 %v481_v7 }
  0x20   : > { %459 = vmatprep.subr.bf16.mxu0 %v492_v1 }
  0x23   : > { %460 = vmatpush3.bf16.msra.mxu0 %v482_v8 }
  0x26   : > { %462 = vmatmul.mubr.bf16.vlgmr.msra.gmra.mrb[0].mxu0 %v483_v9 }
  0xf9   : > { %v308_v11 = vpop.f32.mrb[0].mxu0 }
  0xfa   : > { %v322_v13 = vmul.f32 %v423_v10, %v308_v11  ;;  %v463_v14 = vpop.f32.mrb[1].mxu0 }
  0xfb   : > { %v311_v15 = vpop.f32.mrb[2].mxu0 }
  0xfc   : > { %v331_v16 = vadd.f32 %v424_v12, %v322_v13  ;;  %v323_v17 = vmul.f32 %v423_v10, %v311_v15  ;;  %v464_v18 = vpop.f32.mrb[3].mxu0 }
  0xfe   : > { %v335_v19 = vmul.f32 0.2, %v331_v16  ;;  %v332_v20 = vadd.f32 %v424_v12, %v323_v17  ;;  %vm333_vm1 = vcmp.gt.f32.partialorder %v331_v16, 0.0 }
 0x100   : > { %vm334_vm2 = vcmp.gt.f32.partialorder %v332_v20, 0.0  ;;  %v336_v21 = vmul.f32 0.2, %v332_v20  ;;  %v337_v22 = vsel %vm333_vm1, %v331_v16, %v335_v19 }
 0x102   : > { %v338_v23 = vsel %vm334_vm2, %v332_v20, %v336_v21 }
 0x103   : > { %v434_v24 = vpack.c.bf16 %v338_v23, %v337_v22 }
 0x105   : > { %435 = vst [vmem:[%s199_s19] sm:$0xff] %v434_v24  }
 0x106 PF: > { %s14_s15 = sadd.s32 1, %s490_s15  }
 0x107   : > { %p11_p4 = scmp.ge.s32.totalorder %s14_s15, 4  }
 0x109   :  { %13 = sbr.rel (!%p11_p4) target bundleno = 1 (0x1), region = 66 }

// kernel: d_net32_forward.9
= control target key start
LH: loop header
LB: loop body
LE: loop exit
PB: predicated region body
PF: predicated region fallthrough
CT: control target
= control target key end

     0   :  { %s514_s15 = smov 0   ;;  %s568_s0 = inlined_call_operand.vmem [shape: bf16[32,144], index: 0, kind: input, shape index: {}]   ;;  %s569_s1 = inlined_call_operand.vmem [shape: bf16[144,128], index: 1, kind: input, shape index: {}]   ;;  %s570_s2 = inlined_call_operand.vmem [shape: f32[1,128], index: 2, kind: input, shape index: {}]   ;;  %s571_s3 = inlined_call_operand.vmem [shape: f32[1,128], index: 3, kind: input, shape index: {}]   ;;  %s572_s4 = inlined_call_operand.vmem [shape: bf16[32,128], index: 4, kind: output, shape index: {}]  }
   0x1 LB: > { %s423_s16 = sadd.s32 4294967295, %s486_s15   ;;  %p427_p0 = scmp.ge.s32.totalorder %s486_s15, 1  ;;  %s486_s15 = sphi %s514_s15, %s14_s15  }
   0x2   : > { %p164_p1 = scmp.lt.s32.totalorder %s486_s15, 3 }
   0x4   : > { %p165_p2 = pnand %p427_p0, %p164_p1 }
   0x5   : > { %v468_v0 = vld [vmem:[%s569_s1] sm:$0xff] (!%p165_p2)   ;;  %v488_v1 = vmov (!%p165_p2), 0   ;;  %s428_s19 = sshll.u32 (!%p165_p2), %s423_s16, 1  ;;  %v469_v2 = vld [vmem:[%s569_s1 + $0x8] sm:$0xff] (!%p165_p2)   ;;  %v470_v3 = vld [vmem:[%s569_s1 + $0x10] sm:$0xff] (!%p165_p2)   ;;  %vm288_vm0 = vcmask (!%p165_p2), 130048  }
   0x6   : > { %168 = sbr.rel (%p165_p2) target bundleno = 266 (0x10a), region = 36  ;;  %292 = vmatprep.subr.bf16.mxu0 (!%p165_p2), %v488_v1  ;;  %p192_p3 = scmp.lt.s32.totalorder (!%p165_p2), %s428_s19, 3  ;;  %v471_v4 = vld [vmem:[%s569_s1 + $0x18] sm:$0xff] (!%p165_p2)   ;;  %v472_v6 = vld [vmem:[%s569_s1 + $0x20] sm:$0xff] (!%p165_p2)   ;;  %v473_v7 = vld [vmem:[%s569_s1 + $0x28] sm:$0xff] (!%p165_p2)  }
   0x7   : > { %293 = vmatpush1.bf16.msra.mxu0 (!%p165_p2), %v468_v0  ;;  %v474_v8 = vld [vmem:[%s569_s1 + $0x30] sm:$0xff] (!%p165_p2)   ;;  %v475_v9 = vld [vmem:[%s569_s1 + $0x38] sm:$0xff] (!%p165_p2)   ;;  %v476_v10 = vld [vmem:[%s569_s1 + $0x40] sm:$0xff] (!%p165_p2)  }
   0x8   : > { %294 = vmatprep.subr.bf16.mxu0 (!%p165_p2), %v488_v1  ;;  %v445_v12 = vld [vmem:[%s570_s2] ss:$0 sm:$0xff] (!%p165_p2) }
   0x9   : > { %v446_v14 = vld [vmem:[%s571_s3] ss:$0 sm:$0xff] (!%p165_p2) }
   0xb   : > { %295 = vmatpush1.bf16.msra.mxu0 (!%p165_p2), %v469_v2 }
   0xc   : > { %296 = vmatprep.subr.bf16.mxu0 (!%p165_p2), %v488_v1 }
   0xd   : > { %s574_s19 = smov (!%p192_p3, %s428_s19), 3 }
   0xe   : > { %s451_s24 = sshll.u32 %s574_s19, 3  ;;  %s432_s20 = sshll.u32 %s574_s19, 2 }
   0xf   : > { %s196_s27 = scalar_lea.vmem %s568_s0, %s451_s24  ;;  %297 = vmatpush1.bf16.msra.mxu0 %v470_v3  ;;  %s202_s23 = scalar_lea.vmem %s572_s4, %s432_s20 }
  0x10   : > { %v479_v5 = vld [vmem:[%s196_s27 + $0x4] ss:$8 sps:$4 sm:$0xff]   ;;  %298 = vmatprep.subr.bf16.mxu0 %v488_v1  ;;  %v477_v11 = vld [vmem:[%s196_s27] ss:$8 sps:$4 sm:$0xff]  }
  0x11   : > { %444 = vmatprep.mubr.msk.bf16.mxu0 %vm288_vm0, %v479_v5 }
  0x13   : > { %299 = vmatpush1.bf16.msra.mxu0 %v471_v4 }
  0x14   : > { %300 = vmatprep.subr.bf16.mxu0 %v488_v1 }
  0x17   : > { %301 = vmatpush1.bf16.msra.mxu0 %v472_v6 }
  0x18   : > { %302 = vmatprep.subr.bf16.mxu0 %v488_v1 }
  0x1b   : > { %303 = vmatpush1.bf16.msra.mxu0 %v473_v7 }
  0x1c   : > { %304 = vmatprep.subr.bf16.mxu0 %v488_v1 }
  0x1f   : > { %305 = vmatpush1.bf16.msra.mxu0 %v474_v8 }
  0x20   : > { %306 = vmatprep.subr.bf16.mxu0 %v488_v1 }
  0x23   : > { %307 = vmatpush1.bf16.msra.mxu0 %v475_v9 }
  0x24   : > { %308 = vmatprep.subr.bf16.mxu0 %v488_v1 }
  0x27   : > { %309 = vmatpush1.bf16.msra.mxu0 %v476_v10 }
  0x2a   : > { %325 = vmatmul.mubr.bf16.vlgmr.msra.gmra.mrb[0].mxu0 %v477_v11 }
  0xfd   : > { %v326_v13 = vpop.f32.mrb[0].mxu0 }
  0xfe   : > { %v340_v15 = vmul.f32 %v445_v12, %v326_v13  ;;  %v328_v16 = vpop.f32.mrb[1].mxu0 }
  0xff   : > { %v329_v17 = vpop.f32.mrb[2].mxu0 }
 0x100   : > { %v349_v18 = vadd.f32 %v446_v14, %v340_v15  ;;  %v341_v19 = vmul.f32 %v445_v12, %v329_v17  ;;  %v331_v20 = vpop.f32.mrb[3].mxu0 }
 0x102   : > { %v353_v21 = vmul.f32 0.2, %v349_v18  ;;  %v350_v22 = vadd.f32 %v446_v14, %v341_v19  ;;  %vm351_vm1 = vcmp.gt.f32.partialorder %v349_v18, 0.0 }
 0x104   : > { %vm352_vm2 = vcmp.gt.f32.partialorder %v350_v22, 0.0  ;;  %v354_v23 = vmul.f32 0.2, %v350_v22  ;;  %v355_v24 = vsel %vm351_vm1, %v349_v18, %v353_v21 }
 0x106   : > { %v356_v25 = vsel %vm352_vm2, %v350_v22, %v354_v23 }
 0x107   : > { %v457_v26 = vpack.c.bf16 %v356_v25, %v355_v24 }
 0x109   : > { %458 = vst [vmem:[%s202_s23] sm:$0xff] %v457_v26  }
 0x10a PF: > { %s14_s15 = sadd.s32 1, %s486_s15  }
 0x10b   : > { %p11_p4 = scmp.ge.s32.totalorder %s14_s15, 4  }
 0x10d   :  { %13 = sbr.rel (!%p11_p4) target bundleno = 1 (0x1), region = 66 }

// kernel: d_net32_forward.10
= control target key start
LH: loop header
LB: loop body
LE: loop exit
PB: predicated region body
PF: predicated region fallthrough
CT: control target
= control target key end

     0   :  { %s754_s15 = smov 0   ;;  %s850_s0 = inlined_call_operand.vmem [shape: bf16[32,360], index: 0, kind: input, shape index: {}]   ;;  %s851_s1 = inlined_call_operand.vmem [shape: bf16[360,128], index: 1, kind: input, shape index: {}]   ;;  %s852_s2 = inlined_call_operand.vmem [shape: f32[1,128], index: 2, kind: input, shape index: {}]   ;;  %s853_s3 = inlined_call_operand.vmem [shape: f32[1,128], index: 3, kind: input, shape index: {}]   ;;  %s854_s4 = inlined_call_operand.vmem [shape: bf16[32,128], index: 4, kind: output, shape index: {}]  }
   0x1 LB: > { %s584_s16 = sadd.s32 4294967295, %s725_s15   ;;  %p588_p0 = scmp.ge.s32.totalorder %s725_s15, 1  ;;  %s725_s15 = sphi %s754_s15, %s14_s15  }
   0x2   : > { %p164_p1 = scmp.lt.s32.totalorder %s725_s15, 3 }
   0x4   : > { %p165_p2 = pnand %p588_p0, %p164_p1 }
   0x5   : > { %v692_v0 = vld [vmem:[%s851_s1 + $0x40] sm:$0xff] (!%p165_p2)   ;;  %v727_v2 = vmov (!%p165_p2), 0.0   ;;  %v694_v3 = vld [vmem:[%s851_s1 + $0x48] sm:$0xff] (!%p165_p2)   ;;  %v697_v6 = vld [vmem:[%s851_s1 + $0x50] sm:$0xff] (!%p165_p2)   ;;  %s589_s29 = sshll.u32 (!%p165_p2), %s584_s16, 1  ;;  %vm728_vm0 = vmmov (!%p165_p2), 0  }
   0x6   : > { %168 = sbr.rel (%p165_p2) target bundleno = 267 (0x10b), region = 36  ;;  %v693_v1 = vld [vmem:[%s851_s1] sm:$0xff] (!%p165_p2)   ;;  %663 = vmatprep.subr.bf16.mxu1 (!%p165_p2), %v727_v2  ;;  %633 = vmatprep.subr.bf16.mxu0 (!%p165_p2), %v692_v0  ;;  %v695_v4 = vld [vmem:[%s851_s1 + $0x8] sm:$0xff] (!%p165_p2)   ;;  %v698_v7 = vld [vmem:[%s851_s1 + $0x10] sm:$0xff] (!%p165_p2)   ;;  %p192_p3 = scmp.lt.s32.totalorder (!%p165_p2), %s589_s29, 3  ;;  %vm408_vm1 = vcmask (!%p165_p2), 1043456  }
   0x7   : > { %634 = vmatpush3.bf16.msra.mxu0 (!%p165_p2), %v693_v1  ;;  %v696_v5 = vld [vmem:[%s851_s1 + $0x80] sm:$0xff] (!%p165_p2)   ;;  %677 = vmatprep.mubr.msk.bf16.mxu1 (!%p165_p2), %vm728_vm0, %v727_v2  ;;  %v699_v8 = vld [vmem:[%s851_s1 + $0x88] sm:$0xff] (!%p165_p2)   ;;  %v700_v9 = vld [vmem:[%s851_s1 + $0x58] sm:$0xff] (!%p165_p2)   ;;  %vm404_vm2 = vcmask (!%p165_p2), 850944  }
   0x8   : > { %635 = vmatprep.subr.bf16.mxu0 (!%p165_p2), %v694_v3  ;;  %664 = vmatpush3.bf16.msra.mxu1 (!%p165_p2), %v696_v5  ;;  %v702_v10 = vld [vmem:[%s851_s1 + $0x90] sm:$0xff] (!%p165_p2)   ;;  %v701_v11 = vld [vmem:[%s851_s1 + $0x18] sm:$0xff] (!%p165_p2)   ;;  %v703_v12 = vld [vmem:[%s851_s1 + $0x60] sm:$0xff] (!%p165_p2)  }
   0x9   : > { %665 = vmatprep.subr.bf16.mxu1 (!%p165_p2), %v727_v2  ;;  %v705_v13 = vld [vmem:[%s851_s1 + $0x98] sm:$0xff] (!%p165_p2)   ;;  %v704_v14 = vld [vmem:[%s851_s1 + $0x20] sm:$0xff] (!%p165_p2)   ;;  %v706_v15 = vld [vmem:[%s851_s1 + $0x68] sm:$0xff] (!%p165_p2)  }
   0xa   : > { %v708_v16 = vld [vmem:[%s851_s1 + $0xa0] sm:$0xff] (!%p165_p2)   ;;  %v707_v17 = vld [vmem:[%s851_s1 + $0x28] sm:$0xff] (!%p165_p2)   ;;  %v709_v18 = vld [vmem:[%s851_s1 + $0x70] sm:$0xff] (!%p165_p2)  }
   0xb   : > { %636 = vmatpush3.bf16.msra.mxu0 (!%p165_p2), %v695_v4  ;;  %v710_v19 = vld [vmem:[%s851_s1 + $0x30] sm:$0xff] (!%p165_p2)   ;;  %v711_v20 = vld [vmem:[%s851_s1 + $0xa8] sm:$0xff] (!%p165_p2)   ;;  %v712_v23 = vld [vmem:[%s851_s1 + $0x78] sm:$0xff] (!%p165_p2)  }
   0xc   : > { %637 = vmatprep.subr.bf16.mxu0 (!%p165_p2), %v697_v6  ;;  %666 = vmatpush3.bf16.msra.mxu1 (!%p165_p2), %v699_v8  ;;  %v714_v21 = vld [vmem:[%s851_s1 + $0xb0] ss:$0 sps:$4 sm:$0xff] (!%p165_p2)   ;;  %v713_v24 = vld [vmem:[%s851_s1 + $0x38] sm:$0xff] (!%p165_p2)   ;;  %v620_v36 = vld [vmem:[%s852_s2] ss:$0 sm:$0xff] (!%p165_p2) }
   0xd   : > { %667 = vmatprep.subr.bf16.mxu1 %v727_v2  ;;  %s856_s29 = smov (!%p192_p3, %s589_s29), 3  ;;  %v410_v25 = vsel %vm408_vm1, %v714_v21, 0  ;;  %v621_v40 = vld [vmem:[%s853_s3] ss:$0 sm:$0xff] }
   0xe   : > { %s681_s23 = smul.u32 12, %s856_s29 }
   0xf   : > { %638 = vmatpush3.bf16.msra.mxu0 %v698_v7 }
  0x10   : > { %639 = vmatprep.subr.bf16.mxu0 %v700_v9  ;;  %668 = vmatpush3.bf16.msra.mxu1 %v702_v10  ;;  %s196_s7 = scalar_lea.vmem %s850_s0, %s681_s23  ;;  %s592_s23 = sshll.u32 %s856_s29, 2 }
  0x11   : > { %669 = vmatprep.subr.bf16.mxu1 %v727_v2  ;;  %v717_v22 = vld [vmem:[%s196_s7 + $0x4] ss:$12 sps:$4 sm:$0xff]   ;;  %v718_v26 = vld [vmem:[%s196_s7 + $0x8] ss:$12 sps:$4 sm:$0xff]   ;;  %v715_v27 = vld [vmem:[%s196_s7] ss:$12 sps:$4 sm:$0xff]   ;;  %s202_s26 = scalar_lea.vmem %s854_s4, %s592_s23 }
  0x12   : > { %444 = vmatprep.mubr.bf16.mxu0 %v717_v22 }
  0x13   : > { %640 = vmatpush3.bf16.msra.mxu0 %v701_v11 }
  0x14   : > { %641 = vmatprep.subr.bf16.mxu0 %v703_v12  ;;  %670 = vmatpush3.bf16.msra.mxu1 %v705_v13 }
  0x15   : > { %671 = vmatprep.subr.bf16.mxu1 %v727_v2 }
  0x17   : > { %642 = vmatpush3.bf16.msra.mxu0 %v704_v14 }
  0x18   : > { %643 = vmatprep.subr.bf16.mxu0 %v706_v15  ;;  %672 = vmatpush3.bf16.msra.mxu1 %v708_v16 }
  0x19   : > { %673 = vmatprep.subr.bf16.mxu1 %v727_v2 }
  0x1b   : > { %644 = vmatpush3.bf16.msra.mxu0 %v707_v17 }
  0x1c   : > { %645 = vmatprep.subr.bf16.mxu0 %v709_v18  ;;  %674 = vmatpush3.bf16.msra.mxu1 %v711_v20 }
  0x1d   : > { %675 = vmatprep.subr.bf16.mxu1 %v727_v2 }
  0x1f   : > { %646 = vmatpush3.bf16.msra.mxu0 %v710_v19 }
  0x20   : > { %647 = vmatprep.subr.bf16.mxu0 %v712_v23  ;;  %676 = vmatpush3.bf16.msra.mxu1 %v410_v25 }
  0x23   : > { %648 = vmatpush3.bf16.msra.mxu0 %v713_v24  ;;  %678 = vmatmul.mubr.msk.bf16.vlgmr.msra.gmra.mrb[0].mxu1 %vm404_vm2, %v718_v26 }
  0x26   : > { %445 = vmatmul.mubr.bf16.vlgmr.msra.gmra.mrb[0].mxu0 %v715_v27 }
  0xf6   : > { %v487_v28 = vpop.f32.mrb[0].mxu1 }
  0xf7   : > { %v679_v30 = vpop.f32.mrb[1].mxu1 }
  0xf8   : > { %v490_v32 = vpop.f32.mrb[2].mxu1 }
  0xf9   : > { %v649_v29 = vpop.f32.mrb[0].mxu0  ;;  %v680_v35 = vpop.f32.mrb[3].mxu1 }
  0xfa   : > { %v650_v31 = vpop.f32.mrb[1].mxu0 }
  0xfb   : > { %v651_v33 = vadd.f32 %v650_v31, %v649_v29  ;;  %v652_v34 = vpop.f32.mrb[2].mxu0 }
  0xfc   : > { %v653_v37 = vpop.f32.mrb[3].mxu0 }
  0xfd   : > { %v488_v38 = vadd.f32 %v651_v33, %v487_v28  ;;  %v654_v39 = vadd.f32 %v653_v37, %v652_v34 }
  0xff   : > { %v501_v41 = vmul.f32 %v620_v36, %v488_v38  ;;  %v491_v42 = vadd.f32 %v654_v39, %v490_v32 }
 0x101   : > { %v510_v43 = vadd.f32 %v621_v40, %v501_v41  ;;  %v502_v44 = vmul.f32 %v620_v36, %v491_v42 }
 0x103   : > { %v514_v45 = vmul.f32 0.2, %v510_v43  ;;  %v511_v46 = vadd.f32 %v621_v40, %v502_v44  ;;  %vm512_vm3 = vcmp.gt.f32.partialorder %v510_v43, 0.0 }
 0x105   : > { %vm513_vm4 = vcmp.gt.f32.partialorder %v511_v46, 0.0  ;;  %v515_v47 = vmul.f32 0.2, %v511_v46  ;;  %v516_v48 = vsel %vm512_vm3, %v510_v43, %v514_v45 }
 0x107   : > { %v517_v49 = vsel %vm513_vm4, %v511_v46, %v515_v47 }
 0x108   : > { %v631_v50 = vpack.c.bf16 %v517_v49, %v516_v48 }
 0x10a   : > { %632 = vst [vmem:[%s202_s26] sm:$0xff] %v631_v50  }
 0x10b PF: > { %s14_s15 = sadd.s32 1, %s725_s15  }
 0x10c   : > { %p11_p4 = scmp.ge.s32.totalorder %s14_s15, 4  }
 0x10e   :  { %13 = sbr.rel (!%p11_p4) target bundleno = 1 (0x1), region = 66 }

// kernel: d_net32_forward.11
= control target key start
LH: loop header
LB: loop body
LE: loop exit
PB: predicated region body
PF: predicated region fallthrough
CT: control target
= control target key end

     0   :  { %v519_v22 = vmov 1983009808   ;;  %v88_v24 = vlaneseq  ;;  %s653_s1 = inlined_call_operand.vmem [shape: bf16[512,128], index: 1, kind: input, shape index: {}]   ;;  %s654_s0 = inlined_call_operand.vmem [shape: bf16[4,512], index: 0, kind: input, shape index: {}]   ;;  %s655_s2 = inlined_call_operand.vmem [shape: f32[1,128], index: 2, kind: input, shape index: {}]   ;;  %s656_s3 = inlined_call_operand.vmem [shape: f32[1,128], index: 3, kind: input, shape index: {}]   ;;  %s657_s4 = inlined_call_operand.vmem [shape: f32[4,128], index: 4, kind: output, shape index: {}]  }
   0x1   :  { %v482_v0 = vld [vmem:[%s653_s1 + $0x40] sm:$0xff]   ;;  %v486_v4 = vld [vmem:[%s653_s1 + $0x48] sm:$0xff]   ;;  %v490_v8 = vld [vmem:[%s653_s1 + $0x50] sm:$0xff]   ;;  %v86_v23 = vunpack.c.l.s4 %v519_v22 }
   0x2   :  { %v483_v1 = vld [vmem:[%s653_s1 + $0xc0] sm:$0xff]   ;;  %437 = vmatprep.subr.bf16.mxu0 %v482_v0  ;;  %v487_v5 = vld [vmem:[%s653_s1 + $0xc8] sm:$0xff]   ;;  %v491_v9 = vld [vmem:[%s653_s1 + $0xd0] sm:$0xff]   ;;  %v89_v30 = vshrl.u32 %v88_v24, 7 }
   0x3   :  { %v484_v2 = vld [vmem:[%s653_s1] sm:$0xff]   ;;  %459 = vmatprep.subr.bf16.mxu1 %v483_v1  ;;  %v488_v6 = vld [vmem:[%s653_s1 + $0x8] sm:$0xff]   ;;  %v492_v10 = vld [vmem:[%s653_s1 + $0x10] sm:$0xff]   ;;  %v87_v29 = vunpack.c.0.s8 %v86_v23 }
   0x4   :  { %v485_v3 = vld [vmem:[%s653_s1 + $0x80] sm:$0xff]   ;;  %438 = vmatpush3.bf16.msra.mxu0 %v484_v2  ;;  %v489_v7 = vld [vmem:[%s653_s1 + $0x88] sm:$0xff]   ;;  %v493_v11 = vld [vmem:[%s653_s1 + $0x90] sm:$0xff]  }
   0x5   :  { %460 = vmatpush3.bf16.msra.mxu1 %v485_v3  ;;  %439 = vmatprep.subr.bf16.mxu0 %v486_v4  ;;  %v494_v12 = vld [vmem:[%s653_s1 + $0x58] sm:$0xff]   ;;  %v498_v16 = vld [vmem:[%s653_s1 + $0x60] sm:$0xff]   ;;  %v502_v20 = vld [vmem:[%s653_s1 + $0x68] sm:$0xff]   ;;  %v90_v35 = vsub.s32 %v87_v29, %v89_v30 }
   0x6   :  { %461 = vmatprep.subr.bf16.mxu1 %v487_v5  ;;  %v495_v13 = vld [vmem:[%s653_s1 + $0xd8] sm:$0xff]   ;;  %v499_v17 = vld [vmem:[%s653_s1 + $0xe0] sm:$0xff]   ;;  %v503_v21 = vld [vmem:[%s653_s1 + $0xe8] sm:$0xff]  }
   0x7   :  { %v496_v14 = vld [vmem:[%s653_s1 + $0x18] sm:$0xff]   ;;  %v500_v18 = vld [vmem:[%s653_s1 + $0x20] sm:$0xff]   ;;  %v504_v25 = vld [vmem:[%s653_s1 + $0x28] sm:$0xff]  }
   0x8   :  { %440 = vmatpush3.bf16.msra.mxu0 %v488_v6  ;;  %v497_v15 = vld [vmem:[%s653_s1 + $0x98] sm:$0xff]   ;;  %v501_v19 = vld [vmem:[%s653_s1 + $0xa0] sm:$0xff]   ;;  %v505_v26 = vld [vmem:[%s653_s1 + $0xa8] sm:$0xff]  }
   0x9   :  { %462 = vmatpush3.bf16.msra.mxu1 %v489_v7  ;;  %441 = vmatprep.subr.bf16.mxu0 %v490_v8  ;;  %v506_v27 = vld [vmem:[%s653_s1 + $0x70] sm:$0xff]   ;;  %v510_v33 = vld [vmem:[%s653_s1 + $0x78] sm:$0xff]   ;;  %v18_v38 = vld [vmem:[%s654_s0] sm:$0xff] }
   0xa   :  { %463 = vmatprep.subr.bf16.mxu1 %v491_v9  ;;  %v507_v28 = vld [vmem:[%s653_s1 + $0xf0] sm:$0xff]   ;;  %v511_v34 = vld [vmem:[%s653_s1 + $0xf8] sm:$0xff]   ;;  %v91_v39 = vrot.slane %v18_v38, %v90_v35  ;;  %v84_v40 = vcombine.high %v18_v38, %v18_v38  ;;  %v435_v53 = vld [vmem:[%s655_s2] ss:$0 sm:$0xff] }
   0xb   :  { %v508_v31 = vld [vmem:[%s653_s1 + $0x30] sm:$0xff]   ;;  %v512_v36 = vld [vmem:[%s653_s1 + $0x38] sm:$0xff]   ;;  %v436_v56 = vld [vmem:[%s656_s3] ss:$0 sm:$0xff] }
   0xc   :  { %442 = vmatpush3.bf16.msra.mxu0 %v492_v10  ;;  %v509_v32 = vld [vmem:[%s653_s1 + $0xb0] sm:$0xff]   ;;  %v513_v37 = vld [vmem:[%s653_s1 + $0xb8] sm:$0xff]   ;;  %v99_v41 = vcombine.high %v91_v39, %v91_v39  ;;  %v98_v42 = vrot.slane %v84_v40, %v90_v35 }
   0xd   :  { %464 = vmatpush3.bf16.msra.mxu1 %v493_v11  ;;  %443 = vmatprep.subr.bf16.mxu0 %v494_v12 }
   0xe   :  { %465 = vmatprep.subr.bf16.mxu1 %v495_v13  ;;  %329 = vmatprep.mubr.bf16.mxu0 %v99_v41  ;;  %v100_v43 = vcombine.high %v98_v42, %v98_v42 }
  0x10   :  { %444 = vmatpush3.bf16.msra.mxu0 %v496_v14  ;;  %369 = vmatprep.mubr.bf16.mxu1 %v100_v43 }
  0x11   :  { %466 = vmatpush3.bf16.msra.mxu1 %v497_v15  ;;  %445 = vmatprep.subr.bf16.mxu0 %v498_v16 }
  0x12   :  { %467 = vmatprep.subr.bf16.mxu1 %v499_v17 }
  0x14   :  { %446 = vmatpush3.bf16.msra.mxu0 %v500_v18 }
  0x15   :  { %468 = vmatpush3.bf16.msra.mxu1 %v501_v19  ;;  %447 = vmatprep.subr.bf16.mxu0 %v502_v20 }
  0x16   :  { %469 = vmatprep.subr.bf16.mxu1 %v503_v21 }
  0x18   :  { %448 = vmatpush3.bf16.msra.mxu0 %v504_v25 }
  0x19   :  { %470 = vmatpush3.bf16.msra.mxu1 %v505_v26  ;;  %449 = vmatprep.subr.bf16.mxu0 %v506_v27 }
  0x1a   :  { %471 = vmatprep.subr.bf16.mxu1 %v507_v28 }
  0x1c   :  { %450 = vmatpush3.bf16.msra.mxu0 %v508_v31 }
  0x1d   :  { %472 = vmatpush3.bf16.msra.mxu1 %v509_v32  ;;  %451 = vmatprep.subr.bf16.mxu0 %v510_v33 }
  0x1e   :  { %473 = vmatprep.subr.bf16.mxu1 %v511_v34 }
  0x20   :  { %452 = vmatpush3.bf16.msra.mxu0 %v512_v36 }
  0x21   :  { %474 = vmatpush3.bf16.msra.mxu1 %v513_v37 }
  0x23   :  { %330 = vmatmul.mubr.bf16.vlgmr.msra.gmra.mrb[0].mxu0 %v91_v39 }
  0x24   :  { %370 = vmatmul.mubr.bf16.vlgmr.msra.gmra.mrb[0].mxu1 %v98_v42 }
  0xf6   :  { %v453_v44 = vpop.f32.mrb[0].mxu0 }
  0xf7   :  { %v454_v45 = vpop.f32.mrb[1].mxu0  ;;  %v475_v46 = vpop.f32.mrb[0].mxu1 }
  0xf8   :  { %v455_v47 = vadd.f32 %v454_v45, %v453_v44  ;;  %v456_v48 = vpop.f32.mrb[2].mxu0  ;;  %v476_v49 = vpop.f32.mrb[1].mxu1 }
  0xf9   :  { %v457_v50 = vpop.f32.mrb[3].mxu0  ;;  %v477_v51 = vadd.f32 %v476_v49, %v475_v46  ;;  %v478_v52 = vpop.f32.mrb[2].mxu1 }
  0xfa   :  { %v479_v54 = vpop.f32.mrb[3].mxu1 }
  0xfb   :  { %v372_v55 = vadd.f32 %v477_v51, %v455_v47 }
  0xfd   :  { %v384_v57 = vmul.f32 %v435_v53, %v372_v55 }
  0xff   :  { %v392_v58 = vadd.f32 %v436_v56, %v384_v57 }
 0x101   :  { %v393_v59 = vsub.f32 0.0, %v392_v58 }
 0x103   :  { %v394_v60 = vmul.f32 1.442695, %v393_v59 }
 0x105   :  { %515 = vpow2.f32 %v394_v60 }
 0x10f   :  { %v516_v61 = vpop.eup %515 }
 0x110   :  { %v396_v62 = vadd.f32 1.0, %v516_v61 }
 0x112   :  { %517 = vrcp.f32 %v396_v62 }
 0x11c   :  { %v518_v63 = vpop.eup %517 }
 0x11d   :  { %398 = vst [vmem:[%s657_s4] sm:$0xf] %v518_v63 }

</bundles_post_ra>
